<compile_context>
chip_gen: v7x
topology: tpu7x:2x2x1
jax: 0.10.0
libtpu: 0.0.40
codegen_flags: <defaults>
</compile_context>

<pallas_src>
import jax
import jax.numpy as jnp
from jax.experimental import pallas as pl
from jax.experimental.pallas import tpu as pltpu

LANE = 128


def _round_up(x, m):
    return -(-x // m) * m


def _mlp_kernel(x_ref, w1_ref, b1_ref, w2_ref, b2_ref, w3_ref, b3_ref,
                w4_ref, b4_ref, o_ref):
    """One (TILE_B, 3072) batch tile: 4 MXU matmuls (bf16 in, f32 acc) + 3 f32 ReLUs."""
    # f32 HBM read; in-kernel bf16 cast (cheap VPU work, avoids a separate
    # wrapper-side convert pass over the dominant HBM operand).
    x = x_ref[...].astype(jnp.bfloat16)

    h = jnp.dot(x, w1_ref[...], preferred_element_type=jnp.float32) + b1_ref[...]
    h = jnp.maximum(h, 0.0).astype(jnp.bfloat16)

    h = jnp.dot(h, w2_ref[...], preferred_element_type=jnp.float32) + b2_ref[...]
    h = jnp.maximum(h, 0.0).astype(jnp.bfloat16)

    h = jnp.dot(h, w3_ref[...], preferred_element_type=jnp.float32) + b3_ref[...]
    h = jnp.maximum(h, 0.0).astype(jnp.bfloat16)

    out = jnp.dot(h, w4_ref[...], preferred_element_type=jnp.float32) + b4_ref[...]
    o_ref[...] = out.astype(o_ref.dtype)  # lane-dense (TILE_B, 128) bf16 store


def prepare_params(params, lane=LANE):
    """One-time parameter prep (hoisted out of the per-call forward path).

    Casts weights to bf16 and zero-pads the last layer's output features to a
    full 128-lane width so the kernel's final store is unmasked & lane-dense.
    """
    (w1, b1), (w2, b2), (w3, b3), (w4, b4) = params
    n_classes = w4.shape[1]
    n_out_pad = max(lane, _round_up(n_classes, lane))

    w4p = jnp.zeros((w4.shape[0], n_out_pad), w4.dtype).at[:, :n_classes].set(w4)
    b4p = jnp.zeros((1, n_out_pad), b4.dtype).at[:, :n_classes].set(b4)

    flat = (w1.astype(jnp.bfloat16), b1.astype(jnp.float32),
            w2.astype(jnp.bfloat16), b2.astype(jnp.float32),
            w3.astype(jnp.bfloat16), b3.astype(jnp.float32),
            w4p.astype(jnp.bfloat16), b4p.astype(jnp.float32))
    return {"flat": flat, "n_classes": n_classes, "n_out_pad": n_out_pad}


def _build_call(b, in_feat, n_out_pad, tile_b, num_tiles, param_shapes,
                vmem_limit, flops, bytes_accessed,
                single_buffer_consts, x_buffers):
    """Construct the pallas_call callable (separated so we can fall back if
    pipeline_mode=pl.Buffered(1) is unsupported by the running JAX)."""

    def const_spec(shape):
        # Full-array block, same block index every grid step -> DMA'd once,
        # stays resident in VMEM across all batch tiles.
        index_map = lambda i, _n=len(shape): (0,) * _n
        if single_buffer_consts:
            # Constant blocks never change: a second pipeline buffer is waste
            # (matters most on v7x's 64 MiB VMEM).
            return pl.BlockSpec(shape, index_map, pipeline_mode=pl.Buffered(1))
        return pl.BlockSpec(shape, index_map)

    x_kwargs = {}
    if x_buffers is not None:
        x_kwargs["pipeline_mode"] = pl.Buffered(x_buffers)  # optional depth sweep (v7x)
    x_spec = pl.BlockSpec((tile_b, in_feat), lambda i: (i, 0), **x_kwargs)

    return pl.pallas_call(
        _mlp_kernel,
        out_shape=jax.ShapeDtypeStruct((b, n_out_pad), jnp.bfloat16),
        grid=(num_tiles,),
        in_specs=[x_spec] + [const_spec(s) for s in param_shapes],
        out_specs=pl.BlockSpec((tile_b, n_out_pad), lambda i: (i, 0)),
        compiler_params=pltpu.CompilerParams(
            dimension_semantics=("parallel",),   # v7x: shard batch tiles across 2 TCs
            vmem_limit_bytes=vmem_limit,
        ),
        cost_estimate=pl.CostEstimate(flops=flops, transcendentals=0,
                                      bytes_accessed=bytes_accessed),
    )


def base_model_forward(x_nchw, prepped, *, tile_b=512, x_buffers=None):
    """Flatten NCHW input exactly like `.view(-1, 32*32*3)` and run the tiled kernel.

    `prepped` is the result of `prepare_params(params)` (weight prep is a
    one-time cost, not paid per forward).
    """
    if not isinstance(prepped, dict):          # convenience: accept raw params
        prepped = prepare_params(prepped)
    flat = prepped["flat"]
    n_classes = prepped["n_classes"]
    n_out_pad = prepped["n_out_pad"]

    b = x_nchw.shape[0]
    x = x_nchw.reshape(b, -1)                  # (B, 3072), same element order as torch .view
    in_feat = x.shape[1]

    # --- batch tile selection -------------------------------------------------
    # multiple of 16 (bf16 sublane packing); capped at the (rounded) batch; for
    # large batches keep >= 4 tiles so v7x's two TensorCores each get >= 2
    # pipelined steps.  No padding of x: ragged last tile handled by Pallas.
    tile_b = max(16, min(tile_b, _round_up(b, 16)))
    if b >= 64:
        tile_b = min(tile_b, _round_up(pl.cdiv(b, 4), 16))
    tile_b = max(16, (tile_b // 16) * 16)
    num_tiles = pl.cdiv(b, tile_b)

    # --- VMEM budget / cost estimate -------------------------------------------
    x_tile_bytes = 2 * tile_b * in_feat * x.dtype.itemsize   # double-buffered x tile
    vmem_limit = int(min(96 << 20, max(32 << 20, x_tile_bytes + (12 << 20))))

    weights = (flat[0], flat[2], flat[4], flat[6])
    flops = 2 * b * sum(w.shape[0] * w.shape[1] for w in weights)
    bytes_accessed = (x.size * x.dtype.itemsize
                      + sum(p.size * p.dtype.itemsize for p in flat)
                      + b * n_out_pad * 2)

    param_shapes = tuple(p.shape for p in flat)
    common = dict(b=b, in_feat=in_feat, n_out_pad=n_out_pad, tile_b=tile_b,
                  num_tiles=num_tiles, param_shapes=param_shapes,
                  vmem_limit=vmem_limit, flops=flops,
                  bytes_accessed=bytes_accessed, x_buffers=x_buffers)

    try:
        out = _build_call(single_buffer_consts=True, **common)(x, *flat)
    except Exception:
        # Fallback: same kernel without single-buffered constant blocks.
        out = _build_call(single_buffer_consts=False, **common)(x, *flat)

    # TODO(synk): under jit with a downstream consumer (e.g. a loss), this
    # slice + cast fuses into the consumer instead of being a separate pass.
    return out[:, :n_classes].astype(jnp.float32)


def init_params(key, input_size, hidden_dim, n_classes):
    """Deterministic init mirroring nn.Linear's default U(-1/sqrt(fan_in), 1/sqrt(fan_in)).

    Weights are stored as (in, out) so the kernel computes x @ W + b.
    Biases are stored as (1, out) for a clean 2-D TPU layout.
    """
    dims = [input_size, hidden_dim * 2, hidden_dim, hidden_dim // 2, n_classes]
    params = []
    for i in range(4):
        fan_in, fan_out = dims[i], dims[i + 1]
        key, kw, kb = jax.random.split(key, 3)
        bound = 1.0 / jnp.sqrt(jnp.float32(fan_in))
        w = jax.random.uniform(kw, (fan_in, fan_out), jnp.float32, -bound, bound)
        bias = jax.random.uniform(kb, (1, fan_out), jnp.float32, -bound, bound)
        params.append((w, bias))
    return params


def reference_forward_bf16(x_nchw, params):
    """Pure-JAX reference using the same bf16-in / f32-accumulate / bf16-out math."""
    (w1, b1), (w2, b2), (w3, b3), (w4, b4) = params
    x = x_nchw.reshape(x_nchw.shape[0], -1).astype(jnp.bfloat16)

    def lin(h, w, bias):
        return jnp.dot(h, w.astype(jnp.bfloat16),
                       preferred_element_type=jnp.float32) + bias

    h = jnp.maximum(lin(x, w1, b1), 0.0).astype(jnp.bfloat16)
    h = jnp.maximum(lin(h, w2, b2), 0.0).astype(jnp.bfloat16)
    h = jnp.maximum(lin(h, w3, b3), 0.0).astype(jnp.bfloat16)
    out = lin(h, w4, b4)
    return out.astype(jnp.bfloat16).astype(jnp.float32)  # kernel rounds output to bf16


def reference_forward_f32(x_nchw, params):
    """Full-precision reference matching the original PyTorch module."""
    x = x_nchw.reshape(x_nchw.shape[0], -1)
    (w1, b1), (w2, b2), (w3, b3), (w4, b4) = params
    h = jnp.maximum(x @ w1 + b1, 0.0)
    h = jnp.maximum(h @ w2 + b2, 0.0)
    h = jnp.maximum(h @ w3 + b3, 0.0)
    return h @ w4 + b4


if __name__ == "__main__":
    # Module hard-codes the flatten to 32*32*3, so input_size must be 3072.
    INPUT_SIZE = 32 * 32 * 3
    HIDDEN_DIM = 32
    N_CLASSES = 10
    BATCH = 2

    key = jax.random.PRNGKey(0)
    key, kx = jax.random.split(key)
    x = jax.random.normal(kx, (BATCH, 3, 32, 32), jnp.float32)  # NCHW, f32

    params = init_params(jax.random.PRNGKey(0), INPUT_SIZE, HIDDEN_DIM, N_CLASSES)
    prepped = prepare_params(params)   # one-time weight prep, hoisted out of forward

    out = base_model_forward(x, prepped)
    out = jax.block_until_ready(out)
    assert out.shape == (BATCH, N_CLASSES)
    assert out.dtype == jnp.float32

    # Exact-math check (same bf16-in / f32-accum / bf16-out recipe as the kernel).
    ref_bf16 = reference_forward_bf16(x, params)
    assert jnp.allclose(out, ref_bf16, atol=3e-3, rtol=3e-3), "mismatch vs bf16 JAX reference"

    # Loose check against the full-f32 PyTorch-equivalent math (bf16 quantization noise only).
    ref_f32 = reference_forward_f32(x, params)
    assert jnp.allclose(out, ref_f32, atol=5e-2, rtol=5e-2), "mismatch vs f32 JAX reference"

    print("KERNEL_OK")
</pallas_src>

<mosaic_0001>
module attributes {stable_mosaic.version = 11 : i64} {
  func.func @_mlp_kernel(%arg0: i32, %arg1: memref<16x3072xf32, #tpu.memory_space<vmem>>, %arg2: memref<3072x64xbf16, #tpu.memory_space<vmem>>, %arg3: memref<1x64xf32, #tpu.memory_space<vmem>>, %arg4: memref<64x32xbf16, #tpu.memory_space<vmem>>, %arg5: memref<1x32xf32, #tpu.memory_space<vmem>>, %arg6: memref<32x16xbf16, #tpu.memory_space<vmem>>, %arg7: memref<1x16xf32, #tpu.memory_space<vmem>>, %arg8: memref<16x128xbf16, #tpu.memory_space<vmem>>, %arg9: memref<1x128xf32, #tpu.memory_space<vmem>>, %arg10: memref<16x128xbf16, #tpu.memory_space<vmem>>) attributes {dimension_semantics = [#tpu.dimension_semantics<parallel>], iteration_bounds = array<i64: 1>, scalar_prefetch = 0 : i64, scratch_operands = 0 : i64, tpu.core_type = #tpu.core_type<tc>, window_params = [{transform_indices = @transform_0, window_bounds = array<i64: 16, 3072>}, {pipeline_mode = #tpu.pipeline_mode<synchronous>, transform_indices = @transform_1, window_bounds = array<i64: 3072, 64>}, {pipeline_mode = #tpu.pipeline_mode<synchronous>, transform_indices = @transform_2, window_bounds = array<i64: 1, 64>}, {pipeline_mode = #tpu.pipeline_mode<synchronous>, transform_indices = @transform_3, window_bounds = array<i64: 64, 32>}, {pipeline_mode = #tpu.pipeline_mode<synchronous>, transform_indices = @transform_4, window_bounds = array<i64: 1, 32>}, {pipeline_mode = #tpu.pipeline_mode<synchronous>, transform_indices = @transform_5, window_bounds = array<i64: 32, 16>}, {pipeline_mode = #tpu.pipeline_mode<synchronous>, transform_indices = @transform_6, window_bounds = array<i64: 1, 16>}, {pipeline_mode = #tpu.pipeline_mode<synchronous>, transform_indices = @transform_7, window_bounds = array<i64: 16, 128>}, {pipeline_mode = #tpu.pipeline_mode<synchronous>, transform_indices = @transform_8, window_bounds = array<i64: 1, 128>}, {transform_indices = @transform_9, window_bounds = array<i64: 16, 128>}]} {
    %c0 = arith.constant 0 : index
    %c0_0 = arith.constant 0 : index
    %0 = vector.load %arg1[%c0, %c0_0] : memref<16x3072xf32, #tpu.memory_space<vmem>>, vector<16x3072xf32>
    %1 = arith.truncf %0 : vector<16x3072xf32> to vector<16x3072xbf16>
    %c0_1 = arith.constant 0 : index
    %c0_2 = arith.constant 0 : index
    %2 = vector.load %arg2[%c0_1, %c0_2] : memref<3072x64xbf16, #tpu.memory_space<vmem>>, vector<3072x64xbf16>
    %cst = arith.constant dense<0.000000e+00> : vector<16x64xf32>
    %3 = tpu.matmul %1, %2, %cst {dimension_numbers = #tpu.dot_dimension_numbers<[1], [0], [0], [1], [0, 0, 1, 1], [], []>} : vector<16x3072xbf16>, vector<3072x64xbf16>, vector<16x64xf32> -> vector<16x64xf32>
    %c0_3 = arith.constant 0 : index
    %c0_4 = arith.constant 0 : index
    %4 = vector.load %arg3[%c0_3, %c0_4] : memref<1x64xf32, #tpu.memory_space<vmem>>, vector<1x64xf32>
    %5 = vector.broadcast %4 : vector<1x64xf32> to vector<16x64xf32>
    %6 = arith.addf %3, %5 : vector<16x64xf32>
    %cst_5 = arith.constant 0.000000e+00 : f32
    %7 = vector.broadcast %cst_5 : f32 to vector<16x64xf32>
    %8 = arith.maximumf %6, %7 : vector<16x64xf32>
    %9 = arith.truncf %8 : vector<16x64xf32> to vector<16x64xbf16>
    %c0_6 = arith.constant 0 : index
    %c0_7 = arith.constant 0 : index
    %10 = vector.load %arg4[%c0_6, %c0_7] : memref<64x32xbf16, #tpu.memory_space<vmem>>, vector<64x32xbf16>
    %cst_8 = arith.constant dense<0.000000e+00> : vector<16x32xf32>
    %11 = tpu.matmul %9, %10, %cst_8 {dimension_numbers = #tpu.dot_dimension_numbers<[1], [0], [0], [1], [0, 0, 1, 1], [], []>} : vector<16x64xbf16>, vector<64x32xbf16>, vector<16x32xf32> -> vector<16x32xf32>
    %c0_9 = arith.constant 0 : index
    %c0_10 = arith.constant 0 : index
    %12 = vector.load %arg5[%c0_9, %c0_10] : memref<1x32xf32, #tpu.memory_space<vmem>>, vector<1x32xf32>
    %13 = vector.broadcast %12 : vector<1x32xf32> to vector<16x32xf32>
    %14 = arith.addf %11, %13 : vector<16x32xf32>
    %cst_11 = arith.constant 0.000000e+00 : f32
    %15 = vector.broadcast %cst_11 : f32 to vector<16x32xf32>
    %16 = arith.maximumf %14, %15 : vector<16x32xf32>
    %17 = arith.truncf %16 : vector<16x32xf32> to vector<16x32xbf16>
    %c0_12 = arith.constant 0 : index
    %c0_13 = arith.constant 0 : index
    %18 = vector.load %arg6[%c0_12, %c0_13] : memref<32x16xbf16, #tpu.memory_space<vmem>>, vector<32x16xbf16>
    %cst_14 = arith.constant dense<0.000000e+00> : vector<16x16xf32>
    %19 = tpu.matmul %17, %18, %cst_14 {dimension_numbers = #tpu.dot_dimension_numbers<[1], [0], [0], [1], [0, 0, 1, 1], [], []>} : vector<16x32xbf16>, vector<32x16xbf16>, vector<16x16xf32> -> vector<16x16xf32>
    %c0_15 = arith.constant 0 : index
    %c0_16 = arith.constant 0 : index
    %20 = vector.load %arg7[%c0_15, %c0_16] : memref<1x16xf32, #tpu.memory_space<vmem>>, vector<1x16xf32>
    %21 = vector.broadcast %20 : vector<1x16xf32> to vector<16x16xf32>
    %22 = arith.addf %19, %21 : vector<16x16xf32>
    %cst_17 = arith.constant 0.000000e+00 : f32
    %23 = vector.broadcast %cst_17 : f32 to vector<16x16xf32>
    %24 = arith.maximumf %22, %23 : vector<16x16xf32>
    %25 = arith.truncf %24 : vector<16x16xf32> to vector<16x16xbf16>
    %c0_18 = arith.constant 0 : index
    %c0_19 = arith.constant 0 : index
    %26 = vector.load %arg8[%c0_18, %c0_19] : memref<16x128xbf16, #tpu.memory_space<vmem>>, vector<16x128xbf16>
    %cst_20 = arith.constant dense<0.000000e+00> : vector<16x128xf32>
    %27 = tpu.matmul %25, %26, %cst_20 {dimension_numbers = #tpu.dot_dimension_numbers<[1], [0], [0], [1], [0, 0, 1, 1], [], []>} : vector<16x16xbf16>, vector<16x128xbf16>, vector<16x128xf32> -> vector<16x128xf32>
    %c0_21 = arith.constant 0 : index
    %c0_22 = arith.constant 0 : index
    %28 = vector.load %arg9[%c0_21, %c0_22] : memref<1x128xf32, #tpu.memory_space<vmem>>, vector<1x128xf32>
    %29 = vector.broadcast %28 : vector<1x128xf32> to vector<16x128xf32>
    %30 = arith.addf %27, %29 : vector<16x128xf32>
    %31 = arith.truncf %30 : vector<16x128xf32> to vector<16x128xbf16>
    %c0_23 = arith.constant 0 : index
    %c0_24 = arith.constant 0 : index
    %32 = vector.load %arg10[%c0_23, %c0_24] : memref<16x128xbf16, #tpu.memory_space<vmem>>, vector<16x128xbf16>
    tpu.vector_store %arg10[%c0_23, %c0_24], %31 {strides = array<i32>} : memref<16x128xbf16, #tpu.memory_space<vmem>>, vector<16x128xbf16>,
    return
  }
  func.func @transform_0(%arg0: i32) -> (i32, i32) {
    %c0_i32 = arith.constant 0 : i32
    %c0_i32_0 = arith.constant 0 : i32
    return %arg0, %c0_i32 : i32, i32
  }
  func.func @transform_1(%arg0: i32) -> (i32, i32) {
    %c0_i32 = arith.constant 0 : i32
    %c0_i32_0 = arith.constant 0 : i32
    %c0_i32_1 = arith.constant 0 : i32
    return %c0_i32, %c0_i32_0 : i32, i32
  }
  func.func @transform_2(%arg0: i32) -> (i32, i32) {
    %c0_i32 = arith.constant 0 : i32
    %c0_i32_0 = arith.constant 0 : i32
    %c0_i32_1 = arith.constant 0 : i32
    return %c0_i32, %c0_i32_0 : i32, i32
  }
  func.func @transform_3(%arg0: i32) -> (i32, i32) {
    %c0_i32 = arith.constant 0 : i32
    %c0_i32_0 = arith.constant 0 : i32
    %c0_i32_1 = arith.constant 0 : i32
    return %c0_i32, %c0_i32_0 : i32, i32
  }
  func.func @transform_4(%arg0: i32) -> (i32, i32) {
    %c0_i32 = arith.constant 0 : i32
    %c0_i32_0 = arith.constant 0 : i32
    %c0_i32_1 = arith.constant 0 : i32
    return %c0_i32, %c0_i32_0 : i32, i32
  }
  func.func @transform_5(%arg0: i32) -> (i32, i32) {
    %c0_i32 = arith.constant 0 : i32
    %c0_i32_0 = arith.constant 0 : i32
    %c0_i32_1 = arith.constant 0 : i32
    return %c0_i32, %c0_i32_0 : i32, i32
  }
  func.func @transform_6(%arg0: i32) -> (i32, i32) {
    %c0_i32 = arith.constant 0 : i32
    %c0_i32_0 = arith.constant 0 : i32
    %c0_i32_1 = arith.constant 0 : i32
    return %c0_i32, %c0_i32_0 : i32, i32
  }
  func.func @transform_7(%arg0: i32) -> (i32, i32) {
    %c0_i32 = arith.constant 0 : i32
    %c0_i32_0 = arith.constant 0 : i32
    %c0_i32_1 = arith.constant 0 : i32
    return %c0_i32, %c0_i32_0 : i32, i32
  }
  func.func @transform_8(%arg0: i32) -> (i32, i32) {
    %c0_i32 = arith.constant 0 : i32
    %c0_i32_0 = arith.constant 0 : i32
    %c0_i32_1 = arith.constant 0 : i32
    return %c0_i32, %c0_i32_0 : i32, i32
  }
  func.func @transform_9(%arg0: i32) -> (i32, i32) {
    %c0_i32 = arith.constant 0 : i32
    %c0_i32_0 = arith.constant 0 : i32
    return %arg0, %c0_i32 : i32, i32
  }
}

module attributes {stable_mosaic.version = 11 : i64} {
  func.func @_mlp_kernel(%arg0: i32, %arg1: memref<16x3072xf32, #tpu.memory_space<vmem>>, %arg2: memref<3072x64xbf16, #tpu.memory_space<vmem>>, %arg3: memref<1x64xf32, #tpu.memory_space<vmem>>, %arg4: memref<64x32xbf16, #tpu.memory_space<vmem>>, %arg5: memref<1x32xf32, #tpu.memory_space<vmem>>, %arg6: memref<32x16xbf16, #tpu.memory_space<vmem>>, %arg7: memref<1x16xf32, #tpu.memory_space<vmem>>, %arg8: memref<16x128xbf16, #tpu.memory_space<vmem>>, %arg9: memref<1x128xf32, #tpu.memory_space<vmem>>, %arg10: memref<16x128xbf16, #tpu.memory_space<vmem>>) attributes {dimension_semantics = [#tpu.dimension_semantics<parallel>], iteration_bounds = array<i64: 1>, scalar_prefetch = 0 : i64, scratch_operands = 0 : i64, tpu.core_type = #tpu.core_type<tc>, window_params = [{transform_indices = @transform_0, window_bounds = array<i64: 16, 3072>}, {pipeline_mode = #tpu.pipeline_mode<synchronous>, transform_indices = @transform_1, window_bounds = array<i64: 3072, 64>}, {pipeline_mode = #tpu.pipeline_mode<synchronous>, transform_indices = @transform_2, window_bounds = array<i64: 1, 64>}, {pipeline_mode = #tpu.pipeline_mode<synchronous>, transform_indices = @transform_3, window_bounds = array<i64: 64, 32>}, {pipeline_mode = #tpu.pipeline_mode<synchronous>, transform_indices = @transform_4, window_bounds = array<i64: 1, 32>}, {pipeline_mode = #tpu.pipeline_mode<synchronous>, transform_indices = @transform_5, window_bounds = array<i64: 32, 16>}, {pipeline_mode = #tpu.pipeline_mode<synchronous>, transform_indices = @transform_6, window_bounds = array<i64: 1, 16>}, {pipeline_mode = #tpu.pipeline_mode<synchronous>, transform_indices = @transform_7, window_bounds = array<i64: 16, 128>}, {pipeline_mode = #tpu.pipeline_mode<synchronous>, transform_indices = @transform_8, window_bounds = array<i64: 1, 128>}, {transform_indices = @transform_9, window_bounds = array<i64: 16, 128>}]} {
    %c0 = arith.constant 0 : index
    %c0_0 = arith.constant 0 : index
    %0 = vector.load %arg1[%c0, %c0_0] : memref<16x3072xf32, #tpu.memory_space<vmem>>, vector<16x3072xf32>
    %1 = arith.truncf %0 : vector<16x3072xf32> to vector<16x3072xbf16>
    %c0_1 = arith.constant 0 : index
    %c0_2 = arith.constant 0 : index
    %2 = vector.load %arg2[%c0_1, %c0_2] : memref<3072x64xbf16, #tpu.memory_space<vmem>>, vector<3072x64xbf16>
    %cst = arith.constant dense<0.000000e+00> : vector<16x64xf32>
    %3 = tpu.matmul %1, %2, %cst {dimension_numbers = #tpu.dot_dimension_numbers<[1], [0], [0], [1], [0, 0, 1, 1], [], []>} : vector<16x3072xbf16>, vector<3072x64xbf16>, vector<16x64xf32> -> vector<16x64xf32>
    %c0_3 = arith.constant 0 : index
    %c0_4 = arith.constant 0 : index
    %4 = vector.load %arg3[%c0_3, %c0_4] : memref<1x64xf32, #tpu.memory_space<vmem>>, vector<1x64xf32>
    %5 = vector.broadcast %4 : vector<1x64xf32> to vector<16x64xf32>
    %6 = arith.addf %3, %5 : vector<16x64xf32>
    %cst_5 = arith.constant 0.000000e+00 : f32
    %7 = vector.broadcast %cst_5 : f32 to vector<16x64xf32>
    %8 = arith.maximumf %6, %7 : vector<16x64xf32>
    %9 = arith.truncf %8 : vector<16x64xf32> to vector<16x64xbf16>
    %c0_6 = arith.constant 0 : index
    %c0_7 = arith.constant 0 : index
    %10 = vector.load %arg4[%c0_6, %c0_7] : memref<64x32xbf16, #tpu.memory_space<vmem>>, vector<64x32xbf16>
    %cst_8 = arith.constant dense<0.000000e+00> : vector<16x32xf32>
    %11 = tpu.matmul %9, %10, %cst_8 {dimension_numbers = #tpu.dot_dimension_numbers<[1], [0], [0], [1], [0, 0, 1, 1], [], []>} : vector<16x64xbf16>, vector<64x32xbf16>, vector<16x32xf32> -> vector<16x32xf32>
    %c0_9 = arith.constant 0 : index
    %c0_10 = arith.constant 0 : index
    %12 = vector.load %arg5[%c0_9, %c0_10] : memref<1x32xf32, #tpu.memory_space<vmem>>, vector<1x32xf32>
    %13 = vector.broadcast %12 : vector<1x32xf32> to vector<16x32xf32>
    %14 = arith.addf %11, %13 : vector<16x32xf32>
    %cst_11 = arith.constant 0.000000e+00 : f32
    %15 = vector.broadcast %cst_11 : f32 to vector<16x32xf32>
    %16 = arith.maximumf %14, %15 : vector<16x32xf32>
    %17 = arith.truncf %16 : vector<16x32xf32> to vector<16x32xbf16>
    %c0_12 = arith.constant 0 : index
    %c0_13 = arith.constant 0 : index
    %18 = vector.load %arg6[%c0_12, %c0_13] : memref<32x16xbf16, #tpu.memory_space<vmem>>, vector<32x16xbf16>
    %cst_14 = arith.constant dense<0.000000e+00> : vector<16x16xf32>
    %19 = tpu.matmul %17, %18, %cst_14 {dimension_numbers = #tpu.dot_dimension_numbers<[1], [0], [0], [1], [0, 0, 1, 1], [], []>} : vector<16x32xbf16>, vector<32x16xbf16>, vector<16x16xf32> -> vector<16x16xf32>
    %c0_15 = arith.constant 0 : index
    %c0_16 = arith.constant 0 : index
    %20 = vector.load %arg7[%c0_15, %c0_16] : memref<1x16xf32, #tpu.memory_space<vmem>>, vector<1x16xf32>
    %21 = vector.broadcast %20 : vector<1x16xf32> to vector<16x16xf32>
    %22 = arith.addf %19, %21 : vector<16x16xf32>
    %cst_17 = arith.constant 0.000000e+00 : f32
    %23 = vector.broadcast %cst_17 : f32 to vector<16x16xf32>
    %24 = arith.maximumf %22, %23 : vector<16x16xf32>
    %25 = arith.truncf %24 : vector<16x16xf32> to vector<16x16xbf16>
    %c0_18 = arith.constant 0 : index
    %c0_19 = arith.constant 0 : index
    %26 = vector.load %arg8[%c0_18, %c0_19] : memref<16x128xbf16, #tpu.memory_space<vmem>>, vector<16x128xbf16>
    %cst_20 = arith.constant dense<0.000000e+00> : vector<16x128xf32>
    %27 = tpu.matmul %25, %26, %cst_20 {dimension_numbers = #tpu.dot_dimension_numbers<[1], [0], [0], [1], [0, 0, 1, 1], [], []>} : vector<16x16xbf16>, vector<16x128xbf16>, vector<16x128xf32> -> vector<16x128xf32>
    %c0_21 = arith.constant 0 : index
    %c0_22 = arith.constant 0 : index
    %28 = vector.load %arg9[%c0_21, %c0_22] : memref<1x128xf32, #tpu.memory_space<vmem>>, vector<1x128xf32>
    %29 = vector.broadcast %28 : vector<1x128xf32> to vector<16x128xf32>
    %30 = arith.addf %27, %29 : vector<16x128xf32>
    %31 = arith.truncf %30 : vector<16x128xf32> to vector<16x128xbf16>
    %c0_23 = arith.constant 0 : index
    %c0_24 = arith.constant 0 : index
    %32 = vector.load %arg10[%c0_23, %c0_24] : memref<16x128xbf16, #tpu.memory_space<vmem>>, vector<16x128xbf16>
    tpu.vector_store %arg10[%c0_23, %c0_24], %31 {strides = array<i32>} : memref<16x128xbf16, #tpu.memory_space<vmem>>, vector<16x128xbf16>,
    return
  }
  func.func @transform_0(%arg0: i32) -> (i32, i32) {
    %c0_i32 = arith.constant 0 : i32
    %c0_i32_0 = arith.constant 0 : i32
    return %arg0, %c0_i32 : i32, i32
  }
  func.func @transform_1(%arg0: i32) -> (i32, i32) {
    %c0_i32 = arith.constant 0 : i32
    %c0_i32_0 = arith.constant 0 : i32
    %c0_i32_1 = arith.constant 0 : i32
    return %c0_i32, %c0_i32_0 : i32, i32
  }
  func.func @transform_2(%arg0: i32) -> (i32, i32) {
    %c0_i32 = arith.constant 0 : i32
    %c0_i32_0 = arith.constant 0 : i32
    %c0_i32_1 = arith.constant 0 : i32
    return %c0_i32, %c0_i32_0 : i32, i32
  }
  func.func @transform_3(%arg0: i32) -> (i32, i32) {
    %c0_i32 = arith.constant 0 : i32
    %c0_i32_0 = arith.constant 0 : i32
    %c0_i32_1 = arith.constant 0 : i32
    return %c0_i32, %c0_i32_0 : i32, i32
  }
  func.func @transform_4(%arg0: i32) -> (i32, i32) {
    %c0_i32 = arith.constant 0 : i32
    %c0_i32_0 = arith.constant 0 : i32
    %c0_i32_1 = arith.constant 0 : i32
    return %c0_i32, %c0_i32_0 : i32, i32
  }
  func.func @transform_5(%arg0: i32) -> (i32, i32) {
    %c0_i32 = arith.constant 0 : i32
    %c0_i32_0 = arith.constant 0 : i32
    %c0_i32_1 = arith.constant 0 : i32
    return %c0_i32, %c0_i32_0 : i32, i32
  }
  func.func @transform_6(%arg0: i32) -> (i32, i32) {
    %c0_i32 = arith.constant 0 : i32
    %c0_i32_0 = arith.constant 0 : i32
    %c0_i32_1 = arith.constant 0 : i32
    return %c0_i32, %c0_i32_0 : i32, i32
  }
  func.func @transform_7(%arg0: i32) -> (i32, i32) {
    %c0_i32 = arith.constant 0 : i32
    %c0_i32_0 = arith.constant 0 : i32
    %c0_i32_1 = arith.constant 0 : i32
    return %c0_i32, %c0_i32_0 : i32, i32
  }
  func.func @transform_8(%arg0: i32) -> (i32, i32) {
    %c0_i32 = arith.constant 0 : i32
    %c0_i32_0 = arith.constant 0 : i32
    %c0_i32_1 = arith.constant 0 : i32
    return %c0_i32, %c0_i32_0 : i32, i32
  }
  func.func @transform_9(%arg0: i32) -> (i32, i32) {
    %c0_i32 = arith.constant 0 : i32
    %c0_i32_0 = arith.constant 0 : i32
    return %arg0, %c0_i32 : i32, i32
  }
}

</mosaic_0001>

<bundles_post_ra>
// kernel: tpu_custom_call.1
= control target key start
LH: loop header
LB: loop body
LE: loop exit
PB: predicated region body
PF: predicated region fallthrough
CT: control target
= control target key end

     0   :  { %14 = vsyncpa [#allocation3], 0  ;;  %v137_v29 = vlaneseq  ;;  %v3786_v33 = vmov 1983009808   ;;  %vm3788_vm0 = vmmov 0   ;;  %vm2711_vm1 = vcmask 523264   ;;  %s4675_s0 = inlined_call_operand.vmem [shape: f32[2,3072], index: 0, kind: input, shape index: {}]   ;;  %s4676_s1 = inlined_call_operand.vmem [shape: bf16[3072,64], index: 1, kind: input, shape index: {}]   ;;  %s4677_s2 = inlined_call_operand.vmem [shape: f32[1,64], index: 2, kind: input, shape index: {}]   ;;  %s4678_s3 = inlined_call_operand.vmem [shape: bf16[64,32], index: 3, kind: input, shape index: {}]   ;;  %s4679_s4 = inlined_call_operand.vmem [shape: f32[1,32], index: 4, kind: input, shape index: {}]   ;;  %s4680_s5 = inlined_call_operand.vmem [shape: bf16[32,16], index: 5, kind: input, shape index: {}]   ;;  %s4681_s6 = inlined_call_operand.vmem [shape: f32[1,16], index: 6, kind: input, shape index: {}]   ;;  %s4682_s7 = inlined_call_operand.vmem [shape: bf16[16,128], index: 7, kind: input, shape index: {}]   ;;  %s4683_s8 = inlined_call_operand.vmem [shape: f32[1,128], index: 8, kind: input, shape index: {}]   ;;  %s4684_s9 = inlined_call_operand.hbm [shape: bf16[2,128], index: 9, kind: output, shape index: {}]  }
   0x1   :  { %v3491_v0 = vld [vmem:[%s4676_s1 + $0x40] sm:$0xff]   ;;  %v3495_v4 = vld [vmem:[%s4676_s1 + $0x48] sm:$0xff]   ;;  %v3499_v8 = vld [vmem:[%s4676_s1 + $0x50] sm:$0xff]   ;;  %v135_v34 = vunpack.c.l.s4 %v3786_v33  ;;  %vm2782_vm2 = vcmask 261120   ;;  %vm2845_vm3 = vcmask 130048  }
   0x2   :  { %v3492_v1 = vld [vmem:[%s4676_s1 + $0xc0] sm:$0xff]   ;;  %3184 = vmatprep.subr.bf16.mxu0 %v3491_v0  ;;  %v3496_v5 = vld [vmem:[%s4676_s1 + $0xc8] sm:$0xff]   ;;  %v3500_v9 = vld [vmem:[%s4676_s1 + $0xd0] sm:$0xff]   ;;  %v3939_v35 = vshrl.u32 %v137_v29, 7 }
   0x3   :  { %v3493_v2 = vld [vmem:[%s4676_s1] sm:$0xff]   ;;  %3206 = vmatprep.subr.bf16.mxu1 %v3492_v1  ;;  %v3497_v6 = vld [vmem:[%s4676_s1 + $0x8] sm:$0xff]   ;;  %v3501_v10 = vld [vmem:[%s4676_s1 + $0x10] sm:$0xff]   ;;  %v136_v38 = vunpack.c.0.s8 %v135_v34 }
   0x4   :  { %v3494_v3 = vld [vmem:[%s4676_s1 + $0x80] sm:$0xff]   ;;  %3185 = vmatpush3.bf16.msra.mxu0 %v3493_v2  ;;  %v3498_v7 = vld [vmem:[%s4676_s1 + $0x88] sm:$0xff]   ;;  %v3502_v11 = vld [vmem:[%s4676_s1 + $0x90] sm:$0xff]  }
   0x5   :  { %3207 = vmatpush3.bf16.msra.mxu1 %v3494_v3  ;;  %3186 = vmatprep.subr.bf16.mxu0 %v3495_v4  ;;  %v3503_v12 = vld [vmem:[%s4676_s1 + $0x58] sm:$0xff]   ;;  %v3507_v16 = vld [vmem:[%s4676_s1 + $0x60] sm:$0xff]   ;;  %v3511_v20 = vld [vmem:[%s4676_s1 + $0x68] sm:$0xff]   ;;  %v3960_v43 = vsub.s32 %v136_v38, %v3939_v35 }
   0x6   :  { %3208 = vmatprep.subr.bf16.mxu1 %v3496_v5  ;;  %v3504_v13 = vld [vmem:[%s4676_s1 + $0xd8] sm:$0xff]   ;;  %v3508_v17 = vld [vmem:[%s4676_s1 + $0xe0] sm:$0xff]   ;;  %v3512_v21 = vld [vmem:[%s4676_s1 + $0xe8] sm:$0xff]  }
   0x7   :  { %v3505_v14 = vld [vmem:[%s4676_s1 + $0x18] sm:$0xff]   ;;  %v3509_v18 = vld [vmem:[%s4676_s1 + $0x20] sm:$0xff]   ;;  %v3513_v22 = vld [vmem:[%s4676_s1 + $0x28] sm:$0xff]  }
   0x8   :  { %3187 = vmatpush3.bf16.msra.mxu0 %v3497_v6  ;;  %v3506_v15 = vld [vmem:[%s4676_s1 + $0x98] sm:$0xff]   ;;  %v3510_v19 = vld [vmem:[%s4676_s1 + $0xa0] sm:$0xff]   ;;  %v3514_v23 = vld [vmem:[%s4676_s1 + $0xa8] sm:$0xff]  }
   0x9   :  { %3209 = vmatpush3.bf16.msra.mxu1 %v3498_v7  ;;  %3188 = vmatprep.subr.bf16.mxu0 %v3499_v8  ;;  %v3515_v24 = vld [vmem:[%s4676_s1 + $0x70] sm:$0xff]   ;;  %v3519_v28 = vld [vmem:[%s4676_s1 + $0x78] sm:$0xff]   ;;  %v3535_v46 = vld [vmem:[%s4676_s1 + $0x140] sm:$0xff]  }
   0xa   :  { %3210 = vmatprep.subr.bf16.mxu1 %v3500_v9  ;;  %v3516_v25 = vld [vmem:[%s4676_s1 + $0xf0] sm:$0xff]   ;;  %v3520_v30 = vld [vmem:[%s4676_s1 + $0xf8] sm:$0xff]   ;;  %v3536_v51 = vld [vmem:[%s4676_s1 + $0x1c0] sm:$0xff]  }
   0xb   :  { %v3517_v26 = vld [vmem:[%s4676_s1 + $0x30] sm:$0xff]   ;;  %v3521_v31 = vld [vmem:[%s4676_s1 + $0x38] sm:$0xff]   ;;  %v3537_v60 = vld [vmem:[%s4676_s1 + $0x100] sm:$0xff]  }
   0xc   :  { %3189 = vmatpush3.bf16.msra.mxu0 %v3501_v10  ;;  %v3518_v27 = vld [vmem:[%s4676_s1 + $0xb0] sm:$0xff]   ;;  %v3522_v32 = vld [vmem:[%s4676_s1 + $0xb8] sm:$0xff]   ;;  %v3538_v1 = vld [vmem:[%s4676_s1 + $0x180] sm:$0xff]  }
   0xd   :  { %3211 = vmatpush3.bf16.msra.mxu1 %v3502_v11  ;;  %3190 = vmatprep.subr.bf16.mxu0 %v3503_v12  ;;  %v3523_v36 = vld [vmem:[%s4675_s0] ss:$48 sps:$4 sm:$0xff]   ;;  %v3531_v41 = vld [vmem:[%s4675_s0 + $0x4] ss:$48 sps:$4 sm:$0xff]   ;;  %v3539_v4 = vld [vmem:[%s4676_s1 + $0x148] sm:$0xff]  }
   0xe   :  { %3212 = vmatprep.subr.bf16.mxu1 %v3504_v13  ;;  %v3525_v37 = vld [vmem:[%s4675_s0 + $0x60] ss:$48 sps:$4 sm:$0xff]   ;;  %v3532_v42 = vld [vmem:[%s4675_s0 + $0x64] ss:$48 sps:$4 sm:$0xff]   ;;  %v140_v47 = vrot.slane %v3523_v36, %v3960_v43  ;;  %v147_v52 = vrot.slane %v3531_v41, %v3960_v43  ;;  %v3540_v7 = vld [vmem:[%s4676_s1 + $0x1c8] sm:$0xff]  }
   0xf   :  { %v3527_v39 = vld [vmem:[%s4675_s0 + $0xc0] ss:$48 sps:$4 sm:$0xff]   ;;  %v3533_v44 = vld [vmem:[%s4675_s0 + $0xc4] ss:$48 sps:$4 sm:$0xff]   ;;  %v154_v48 = vrot.slane %v3525_v37, %v3960_v43  ;;  %v161_v53 = vrot.slane %v3532_v42, %v3960_v43  ;;  %v3541_v8 = vld [vmem:[%s4676_s1 + $0x108] sm:$0xff]  }
  0x10   :  { %3191 = vmatpush3.bf16.msra.mxu0 %v3505_v14  ;;  %v3529_v40 = vld [vmem:[%s4675_s0 + $0x120] ss:$48 sps:$4 sm:$0xff]   ;;  %v3534_v45 = vld [vmem:[%s4675_s0 + $0x124] ss:$48 sps:$4 sm:$0xff]   ;;  %v356_v49 = vrot.slane %v3527_v39, %v3960_v43  ;;  %v363_v54 = vrot.slane %v3533_v44, %v3960_v43  ;;  %v3542_v9 = vld [vmem:[%s4676_s1 + $0x188] sm:$0xff]  }
  0x11   :  { %3213 = vmatpush3.bf16.msra.mxu1 %v3506_v15  ;;  %3192 = vmatprep.subr.bf16.mxu0 %v3507_v16  ;;  %v370_v50 = vrot.slane %v3529_v40, %v3960_v43  ;;  %v377_v55 = vrot.slane %v3534_v45, %v3960_v43  ;;  %v163_v56 = vcombine.high %v140_v47, %v154_v48  ;;  %v3543_v10 = vld [vmem:[%s4676_s1 + $0x150] sm:$0xff]   ;;  %v3547_v14 = vld [vmem:[%s4676_s1 + $0x158] sm:$0xff]  }
  0x12   :  { %3214 = vmatprep.subr.bf16.mxu1 %v3508_v17  ;;  %v162_v58 = vcombine.low %v140_v47, %v154_v48  ;;  %v165_v61 = vcombine.high %v147_v52, %v161_v53  ;;  %v164_v63 = vcombine.low %v147_v52, %v161_v53  ;;  %v3544_v11 = vld [vmem:[%s4676_s1 + $0x1d0] sm:$0xff]   ;;  %v3548_v15 = vld [vmem:[%s4676_s1 + $0x1d8] sm:$0xff]  }
  0x13   :  { %v379_v57 = vcombine.high %v356_v49, %v370_v50  ;;  %v378_v59 = vcombine.low %v356_v49, %v370_v50  ;;  %v381_v62 = vcombine.high %v363_v54, %v377_v55  ;;  %v380_v0 = vcombine.low %v363_v54, %v377_v55  ;;  %v3545_v12 = vld [vmem:[%s4676_s1 + $0x110] sm:$0xff]   ;;  %v3549_v16 = vld [vmem:[%s4676_s1 + $0x118] sm:$0xff]   ;;  %v3579_v49 = vld [vmem:[%s4676_s1 + $0x240] sm:$0xff]  }
  0x14   :  { %3193 = vmatpush3.bf16.msra.mxu0 %v3509_v18  ;;  %v3546_v13 = vld [vmem:[%s4676_s1 + $0x190] sm:$0xff]   ;;  %v3550_v17 = vld [vmem:[%s4676_s1 + $0x198] sm:$0xff]   ;;  %v3551_v18 = vld [vmem:[%s4676_s1 + $0x160] sm:$0xff]  }
  0x15   :  { %3215 = vmatpush3.bf16.msra.mxu1 %v3510_v19  ;;  %3194 = vmatprep.subr.bf16.mxu0 %v3511_v20  ;;  %v611_v2 = vpack.c.bf16 %v379_v57, %v163_v56  ;;  %v610_v3 = vpack.c.bf16 %v378_v59, %v162_v58  ;;  %v613_v5 = vpack.c.bf16 %v381_v62, %v165_v61  ;;  %v3552_v19 = vld [vmem:[%s4676_s1 + $0x1e0] sm:$0xff]   ;;  %v3562_v29 = vld [vmem:[%s4676_s1 + $0x1b0] sm:$0xff]   ;;  %v3566_v33 = vld [vmem:[%s4676_s1 + $0x1b8] sm:$0xff]  }
  0x16   :  { %3216 = vmatprep.subr.bf16.mxu1 %v3512_v21  ;;  %v612_v6 = vpack.c.bf16 %v380_v0, %v164_v63  ;;  %v3553_v20 = vld [vmem:[%s4676_s1 + $0x120] sm:$0xff]   ;;  %v3567_v34 = vld [vmem:[%s4675_s0 + $0x8] ss:$48 sps:$4 sm:$0xff]   ;;  %v3575_v39 = vld [vmem:[%s4675_s0 + $0xc] ss:$48 sps:$4 sm:$0xff]  }
  0x17   :  { %2209 = vmatprep.mubr.bf16.mxu0 %v611_v2  ;;  %2250 = vmatprep.mubr.bf16.mxu1 %v613_v5  ;;  %v3554_v21 = vld [vmem:[%s4676_s1 + $0x1a0] sm:$0xff]   ;;  %v3569_v36 = vld [vmem:[%s4675_s0 + $0x68] ss:$48 sps:$4 sm:$0xff]   ;;  %v176_v40 = vrot.slane %v3567_v34, %v3960_v43  ;;  %v3576_v42 = vld [vmem:[%s4675_s0 + $0x6c] ss:$48 sps:$4 sm:$0xff]   ;;  %v183_v48 = vrot.slane %v3575_v39, %v3960_v43 }
  0x18   :  { %3195 = vmatpush3.bf16.msra.mxu0 %v3513_v22  ;;  %v3555_v22 = vld [vmem:[%s4676_s1 + $0x168] sm:$0xff]   ;;  %v190_v41 = vrot.slane %v3569_v36, %v3960_v43  ;;  %v3580_v54 = vld [vmem:[%s4676_s1 + $0x2c0] sm:$0xff]  }
  0x19   :  { %3217 = vmatpush3.bf16.msra.mxu1 %v3514_v23  ;;  %3196 = vmatprep.subr.bf16.mxu0 %v3515_v24  ;;  %v3556_v23 = vld [vmem:[%s4676_s1 + $0x1e8] sm:$0xff]   ;;  %v3581_v58 = vld [vmem:[%s4676_s1 + $0x200] sm:$0xff]  }
  0x1a   :  { %3218 = vmatprep.subr.bf16.mxu1 %v3516_v25  ;;  %v3557_v24 = vld [vmem:[%s4676_s1 + $0x128] sm:$0xff]   ;;  %v199_v50 = vcombine.high %v176_v40, %v190_v41  ;;  %v198_v56 = vcombine.low %v176_v40, %v190_v41  ;;  %v3582_v63 = vld [vmem:[%s4676_s1 + $0x280] sm:$0xff]  }
  0x1b   :  { %v3558_v25 = vld [vmem:[%s4676_s1 + $0x1a8] sm:$0xff]   ;;  %v3615_v34 = vld [vmem:[%s4675_s0 + $0xd0] ss:$48 sps:$4 sm:$0xff]   ;;  %v3620_v39 = vld [vmem:[%s4675_s0 + $0x74] ss:$48 sps:$4 sm:$0xff]  }
  0x1c   :  { %3197 = vmatpush3.bf16.msra.mxu0 %v3517_v26  ;;  %v3559_v26 = vld [vmem:[%s4676_s1 + $0x170] sm:$0xff]   ;;  %v3571_v37 = vld [vmem:[%s4675_s0 + $0xc8] ss:$48 sps:$4 sm:$0xff]   ;;  %v3577_v44 = vld [vmem:[%s4675_s0 + $0xcc] ss:$48 sps:$4 sm:$0xff]  }
  0x1d   :  { %3219 = vmatpush3.bf16.msra.mxu1 %v3518_v27  ;;  %3198 = vmatprep.subr.bf16.mxu0 %v3519_v28  ;;  %v3560_v27 = vld [vmem:[%s4676_s1 + $0x1f0] sm:$0xff]   ;;  %v3573_v38 = vld [vmem:[%s4675_s0 + $0x128] ss:$48 sps:$4 sm:$0xff]   ;;  %v3578_v45 = vld [vmem:[%s4675_s0 + $0x12c] ss:$48 sps:$4 sm:$0xff]   ;;  %v399_v52 = vrot.slane %v3577_v44, %v3960_v43 }
  0x1e   :  { %3220 = vmatprep.subr.bf16.mxu1 %v3520_v30  ;;  %v3561_v28 = vld [vmem:[%s4676_s1 + $0x130] sm:$0xff]   ;;  %v3563_v30 = vld [vmem:[%s4676_s1 + $0x178] sm:$0xff]   ;;  %v406_v47 = vrot.slane %v3573_v38, %v3960_v43  ;;  %v413_v53 = vrot.slane %v3578_v45, %v3960_v43  ;;  %v3583_v2 = vld [vmem:[%s4676_s1 + $0x248] sm:$0xff]  }
  0x1f   :  { %v3584_v5 = vld [vmem:[%s4676_s1 + $0x2c8] sm:$0xff]   ;;  %v3617_v36 = vld [vmem:[%s4675_s0 + $0x130] ss:$48 sps:$4 sm:$0xff]   ;;  %v3619_v38 = vld [vmem:[%s4675_s0 + $0x14] ss:$48 sps:$4 sm:$0xff]  }
  0x20   :  { %3199 = vmatpush3.bf16.msra.mxu0 %v3521_v31  ;;  %v3564_v31 = vld [vmem:[%s4676_s1 + $0x1f8] sm:$0xff]   ;;  %v416_v62 = vcombine.low %v399_v52, %v413_v53  ;;  %v3621_v40 = vld [vmem:[%s4675_s0 + $0xd4] ss:$48 sps:$4 sm:$0xff]   ;;  %v442_v44 = vrot.slane %v3617_v36, %v3960_v43 }
  0x21   :  { %3221 = vmatpush3.bf16.msra.mxu1 %v3522_v32  ;;  %3228 = vmatprep.subr.bf16.mxu0 %v3535_v46  ;;  %v3565_v32 = vld [vmem:[%s4676_s1 + $0x138] sm:$0xff]   ;;  %v392_v46 = vrot.slane %v3571_v37, %v3960_v43  ;;  %v3622_v45 = vld [vmem:[%s4675_s0 + $0x134] ss:$48 sps:$4 sm:$0xff]  }
  0x22   :  { %3250 = vmatprep.subr.bf16.mxu1 %v3536_v51  ;;  %v197_v51 = vrot.slane %v3576_v42, %v3960_v43  ;;  %v428_v42 = vrot.slane %v3615_v34, %v3960_v43  ;;  %v3663_v34 = vld [vmem:[%s4675_s0 + $0x1c] ss:$48 sps:$4 sm:$0xff]  }
  0x23   :  { %2210 = vmatmul.mubr.bf16.vlgmr.msra.gmra.mrb[0].mxu0 %v610_v3  ;;  %v415_v55 = vcombine.high %v392_v46, %v406_v47  ;;  %v414_v57 = vcombine.low %v392_v46, %v406_v47  ;;  %v219_v46 = vrot.slane %v3619_v38, %v3960_v43  ;;  %v233_v47 = vrot.slane %v3620_v39, %v3960_v43  ;;  %v3664_v36 = vld [vmem:[%s4675_s0 + $0x7c] ss:$48 sps:$4 sm:$0xff]  }
  0x24   :  { %2251 = vmatmul.mubr.bf16.vlgmr.msra.gmra.mrb[0].mxu1 %v612_v6  ;;  %3229 = vmatpush3.bf16.msra.mxu0 %v3537_v60  ;;  %v201_v59 = vcombine.high %v183_v48, %v197_v51  ;;  %v417_v60 = vcombine.high %v399_v52, %v413_v53  ;;  %v200_v61 = vcombine.low %v183_v48, %v197_v51  ;;  %v3585_v6 = vld [vmem:[%s4676_s1 + $0x208] sm:$0xff]  }
  0x25   :  { %3251 = vmatpush3.bf16.msra.mxu1 %v3538_v1  ;;  %3230 = vmatprep.subr.bf16.mxu0 %v3539_v4  ;;  %v615_v0 = vpack.c.bf16 %v415_v55, %v199_v50  ;;  %v614_v1 = vpack.c.bf16 %v414_v57, %v198_v56  ;;  %v435_v48 = vrot.slane %v3621_v40, %v3960_v43  ;;  %v3665_v40 = vld [vmem:[%s4675_s0 + $0xdc] ss:$48 sps:$4 sm:$0xff]  }
  0x26   :  { %3252 = vmatprep.subr.bf16.mxu1 %v3540_v7  ;;  %v617_v3 = vpack.c.bf16 %v417_v60, %v201_v59  ;;  %v616_v4 = vpack.c.bf16 %v416_v62, %v200_v61  ;;  %v3586_v7 = vld [vmem:[%s4676_s1 + $0x288] sm:$0xff]   ;;  %v451_v51 = vcombine.high %v428_v42, %v442_v44  ;;  %v449_v52 = vrot.slane %v3622_v45, %v3960_v43  ;;  %v3626_v62 = vld [vmem:[%s4676_s1 + $0x380] sm:$0xff]  }
  0x27   :  { %2291 = vmatprep.mubr.bf16.mxu0 %v615_v0  ;;  %v237_v55 = vcombine.high %v219_v46, %v233_v47  ;;  %v450_v56 = vcombine.low %v428_v42, %v442_v44  ;;  %v236_v57 = vcombine.low %v219_v46, %v233_v47  ;;  %v3627_v0 = vld [vmem:[%s4676_s1 + $0x348] sm:$0xff]   ;;  %v255_v44 = vrot.slane %v3663_v34, %v3960_v43  ;;  %v3667_v46 = vld [vmem:[%s4676_s1 + $0x440] sm:$0xff]  }
  0x28   :  { %3231 = vmatpush3.bf16.msra.mxu0 %v3541_v8  ;;  %2332 = vmatprep.mubr.bf16.mxu1 %v617_v3  ;;  %v3587_v8 = vld [vmem:[%s4676_s1 + $0x250] sm:$0xff]   ;;  %v453_v60 = vcombine.high %v435_v48, %v449_v52  ;;  %v452_v61 = vcombine.low %v435_v48, %v449_v52  ;;  %v3628_v3 = vld [vmem:[%s4676_s1 + $0x3c8] sm:$0xff]   ;;  %v269_v45 = vrot.slane %v3664_v36, %v3960_v43 }
  0x29   :  { %3253 = vmatpush3.bf16.msra.mxu1 %v3542_v9  ;;  %3232 = vmatprep.subr.bf16.mxu0 %v3543_v10  ;;  %v3588_v9 = vld [vmem:[%s4676_s1 + $0x2d0] sm:$0xff]   ;;  %v471_v48 = vrot.slane %v3665_v40, %v3960_v43 }
  0x2a   :  { %3254 = vmatprep.subr.bf16.mxu1 %v3544_v11  ;;  %v3589_v10 = vld [vmem:[%s4676_s1 + $0x210] sm:$0xff]  }
  0x2b   :  { %v3590_v11 = vld [vmem:[%s4676_s1 + $0x290] sm:$0xff]  }
  0x2c   :  { %3233 = vmatpush3.bf16.msra.mxu0 %v3545_v12  ;;  %v3591_v12 = vld [vmem:[%s4676_s1 + $0x258] sm:$0xff]   ;;  %v3708_v36 = vld [vmem:[%s4675_s0 + $0x84] ss:$48 sps:$4 sm:$0xff]  }
  0x2d   :  { %3255 = vmatpush3.bf16.msra.mxu1 %v3546_v13  ;;  %3234 = vmatprep.subr.bf16.mxu0 %v3547_v14  ;;  %v3592_v13 = vld [vmem:[%s4676_s1 + $0x2d8] sm:$0xff]  }
  0x2e   :  { %3256 = vmatprep.subr.bf16.mxu1 %v3548_v15  ;;  %v3593_v14 = vld [vmem:[%s4676_s1 + $0x218] sm:$0xff]  }
  0x2f   :  { %v3594_v15 = vld [vmem:[%s4676_s1 + $0x298] sm:$0xff]  }
  0x30   :  { %3235 = vmatpush3.bf16.msra.mxu0 %v3549_v16  ;;  %v3595_v16 = vld [vmem:[%s4676_s1 + $0x260] sm:$0xff]  }
  0x31   :  { %3257 = vmatpush3.bf16.msra.mxu1 %v3550_v17  ;;  %3236 = vmatprep.subr.bf16.mxu0 %v3551_v18  ;;  %v3596_v17 = vld [vmem:[%s4676_s1 + $0x2e0] sm:$0xff]  }
  0x32   :  { %3258 = vmatprep.subr.bf16.mxu1 %v3552_v19  ;;  %v3597_v18 = vld [vmem:[%s4676_s1 + $0x220] sm:$0xff]  }
  0x33   :  { %v3598_v19 = vld [vmem:[%s4676_s1 + $0x2a0] sm:$0xff]  }
  0x34   :  { %3237 = vmatpush3.bf16.msra.mxu0 %v3553_v20  ;;  %v3599_v20 = vld [vmem:[%s4676_s1 + $0x268] sm:$0xff]  }
  0x35   :  { %3259 = vmatpush3.bf16.msra.mxu1 %v3554_v21  ;;  %3238 = vmatprep.subr.bf16.mxu0 %v3555_v22  ;;  %v3600_v21 = vld [vmem:[%s4676_s1 + $0x2e8] sm:$0xff]  }
  0x36   :  { %3260 = vmatprep.subr.bf16.mxu1 %v3556_v23  ;;  %v3601_v22 = vld [vmem:[%s4676_s1 + $0x228] sm:$0xff]  }
  0x37   :  { %v3602_v23 = vld [vmem:[%s4676_s1 + $0x2a8] sm:$0xff]  }
  0x38   :  { %3239 = vmatpush3.bf16.msra.mxu0 %v3557_v24  ;;  %v3603_v24 = vld [vmem:[%s4676_s1 + $0x270] sm:$0xff]  }
  0x39   :  { %3261 = vmatpush3.bf16.msra.mxu1 %v3558_v25  ;;  %3240 = vmatprep.subr.bf16.mxu0 %v3559_v26  ;;  %v3604_v25 = vld [vmem:[%s4676_s1 + $0x2f0] sm:$0xff]  }
  0x3a   :  { %3262 = vmatprep.subr.bf16.mxu1 %v3560_v27  ;;  %v3605_v26 = vld [vmem:[%s4676_s1 + $0x230] sm:$0xff]  }
  0x3b   :  { %v3606_v27 = vld [vmem:[%s4676_s1 + $0x2b0] sm:$0xff]  }
  0x3c   :  { %3241 = vmatpush3.bf16.msra.mxu0 %v3561_v28  ;;  %v3607_v28 = vld [vmem:[%s4676_s1 + $0x278] sm:$0xff]  }
  0x3d   :  { %3263 = vmatpush3.bf16.msra.mxu1 %v3562_v29  ;;  %3242 = vmatprep.subr.bf16.mxu0 %v3563_v30  ;;  %v3608_v29 = vld [vmem:[%s4676_s1 + $0x2f8] sm:$0xff]  }
  0x3e   :  { %3264 = vmatprep.subr.bf16.mxu1 %v3564_v31  ;;  %v3609_v30 = vld [vmem:[%s4676_s1 + $0x238] sm:$0xff]  }
  0x3f   :  { %v3610_v31 = vld [vmem:[%s4676_s1 + $0x2b8] sm:$0xff]  }
  0x40   :  { %3243 = vmatpush3.bf16.msra.mxu0 %v3565_v32  ;;  %v3611_v32 = vld [vmem:[%s4675_s0 + $0x10] ss:$48 sps:$4 sm:$0xff]  }
  0x41   :  { %3265 = vmatpush3.bf16.msra.mxu1 %v3566_v33  ;;  %3272 = vmatprep.subr.bf16.mxu0 %v3579_v49  ;;  %v3613_v33 = vld [vmem:[%s4675_s0 + $0x70] ss:$48 sps:$4 sm:$0xff]   ;;  %v212_v37 = vrot.slane %v3611_v32, %v3960_v43  ;;  %v3659_v32 = vld [vmem:[%s4675_s0 + $0xd8] ss:$48 sps:$4 sm:$0xff]  }
  0x42   :  { %3294 = vmatprep.subr.bf16.mxu1 %v3580_v54  ;;  %v226_v41 = vrot.slane %v3613_v33, %v3960_v43  ;;  %v3623_v49 = vld [vmem:[%s4676_s1 + $0x340] sm:$0xff]   ;;  %v3661_v33 = vld [vmem:[%s4675_s0 + $0x138] ss:$48 sps:$4 sm:$0xff]   ;;  %v464_v39 = vrot.slane %v3659_v32, %v3960_v43 }
  0x43   :  { %2292 = vmatmul.mubr.bf16.vlgmr.msra.gmra.mrb[4].mxu0 %v614_v1  ;;  %v3624_v54 = vld [vmem:[%s4676_s1 + $0x3c0] sm:$0xff]   ;;  %v621_v1 = vpack.c.bf16 %v453_v60, %v237_v55  ;;  %v478_v42 = vrot.slane %v3661_v33, %v3960_v43  ;;  %v272_v55 = vcombine.low %v255_v44, %v269_v45 }
  0x44   :  { %2333 = vmatmul.mubr.bf16.vlgmr.msra.gmra.mrb[4].mxu1 %v616_v4  ;;  %3273 = vmatpush3.bf16.msra.mxu0 %v3581_v58  ;;  %v235_v50 = vcombine.high %v212_v37, %v226_v41  ;;  %v234_v53 = vcombine.low %v212_v37, %v226_v41  ;;  %v3625_v58 = vld [vmem:[%s4676_s1 + $0x300] sm:$0xff]   ;;  %v3629_v4 = vld [vmem:[%s4676_s1 + $0x308] sm:$0xff]  }
  0x45   :  { %3295 = vmatpush3.bf16.msra.mxu1 %v3582_v63  ;;  %3274 = vmatprep.subr.bf16.mxu0 %v3583_v2  ;;  %v620_v2 = vpack.c.bf16 %v452_v61, %v236_v57  ;;  %v3666_v41 = vld [vmem:[%s4675_s0 + $0x13c] ss:$48 sps:$4 sm:$0xff]   ;;  %v487_v52 = vcombine.high %v464_v39, %v478_v42  ;;  %v3707_v32 = vld [vmem:[%s4675_s0 + $0x24] ss:$48 sps:$4 sm:$0xff]  }
  0x46   :  { %3296 = vmatprep.subr.bf16.mxu1 %v3584_v5  ;;  %v619_v59 = vpack.c.bf16 %v451_v51, %v235_v50  ;;  %v618_v63 = vpack.c.bf16 %v450_v56, %v234_v53  ;;  %2414 = vmatprep.mubr.bf16.mxu1 %v621_v1  ;;  %v3630_v5 = vld [vmem:[%s4676_s1 + $0x388] sm:$0xff]   ;;  %v3668_v51 = vld [vmem:[%s4676_s1 + $0x4c0] sm:$0xff]   ;;  %v273_v53 = vcombine.high %v255_v44, %v269_v45 }
  0x47   :  { %v3669_v56 = vld [vmem:[%s4676_s1 + $0x400] sm:$0xff]   ;;  %v3672_v1 = vld [vmem:[%s4676_s1 + $0x4c8] sm:$0xff]   ;;  %v305_v45 = vrot.slane %v3708_v36, %v3960_v43 }
  0x48   :  { %3275 = vmatpush3.bf16.msra.mxu0 %v3585_v6  ;;  %2373 = vmatprep.mubr.bf16.mxu0 %v619_v59  ;;  %v3631_v6 = vld [vmem:[%s4676_s1 + $0x350] sm:$0xff]   ;;  %v3670_v59 = vld [vmem:[%s4676_s1 + $0x480] sm:$0xff]  }
  0x49   :  { %3297 = vmatpush3.bf16.msra.mxu1 %v3586_v7  ;;  %3276 = vmatprep.subr.bf16.mxu0 %v3587_v8  ;;  %v3632_v7 = vld [vmem:[%s4676_s1 + $0x3d0] sm:$0xff]  }
  0x4a   :  { %3298 = vmatprep.subr.bf16.mxu1 %v3588_v9  ;;  %v3633_v8 = vld [vmem:[%s4676_s1 + $0x310] sm:$0xff]  }
  0x4b   :  { %v3634_v9 = vld [vmem:[%s4676_s1 + $0x390] sm:$0xff]  }
  0x4c   :  { %3277 = vmatpush3.bf16.msra.mxu0 %v3589_v10  ;;  %v3635_v10 = vld [vmem:[%s4676_s1 + $0x358] sm:$0xff]  }
  0x4d   :  { %3299 = vmatpush3.bf16.msra.mxu1 %v3590_v11  ;;  %3278 = vmatprep.subr.bf16.mxu0 %v3591_v12  ;;  %v3636_v11 = vld [vmem:[%s4676_s1 + $0x3d8] sm:$0xff]  }
  0x4e   :  { %3300 = vmatprep.subr.bf16.mxu1 %v3592_v13  ;;  %v3637_v12 = vld [vmem:[%s4676_s1 + $0x318] sm:$0xff]  }
  0x4f   :  { %v3638_v13 = vld [vmem:[%s4676_s1 + $0x398] sm:$0xff]  }
  0x50   :  { %3279 = vmatpush3.bf16.msra.mxu0 %v3593_v14  ;;  %v3639_v14 = vld [vmem:[%s4676_s1 + $0x360] sm:$0xff]  }
  0x51   :  { %3301 = vmatpush3.bf16.msra.mxu1 %v3594_v15  ;;  %3280 = vmatprep.subr.bf16.mxu0 %v3595_v16  ;;  %v3640_v15 = vld [vmem:[%s4676_s1 + $0x3e0] sm:$0xff]  }
  0x52   :  { %3302 = vmatprep.subr.bf16.mxu1 %v3596_v17  ;;  %v3641_v16 = vld [vmem:[%s4676_s1 + $0x320] sm:$0xff]  }
  0x53   :  { %v3642_v17 = vld [vmem:[%s4676_s1 + $0x3a0] sm:$0xff]  }
  0x54   :  { %3281 = vmatpush3.bf16.msra.mxu0 %v3597_v18  ;;  %v3643_v18 = vld [vmem:[%s4676_s1 + $0x368] sm:$0xff]  }
  0x55   :  { %3303 = vmatpush3.bf16.msra.mxu1 %v3598_v19  ;;  %3282 = vmatprep.subr.bf16.mxu0 %v3599_v20  ;;  %v3644_v19 = vld [vmem:[%s4676_s1 + $0x3e8] sm:$0xff]  }
  0x56   :  { %3304 = vmatprep.subr.bf16.mxu1 %v3600_v21  ;;  %v3645_v20 = vld [vmem:[%s4676_s1 + $0x328] sm:$0xff]  }
  0x57   :  { %v3646_v21 = vld [vmem:[%s4676_s1 + $0x3a8] sm:$0xff]  }
  0x58   :  { %3283 = vmatpush3.bf16.msra.mxu0 %v3601_v22  ;;  %v3647_v22 = vld [vmem:[%s4676_s1 + $0x370] sm:$0xff]  }
  0x59   :  { %3305 = vmatpush3.bf16.msra.mxu1 %v3602_v23  ;;  %3284 = vmatprep.subr.bf16.mxu0 %v3603_v24  ;;  %v3648_v23 = vld [vmem:[%s4676_s1 + $0x3f0] sm:$0xff]  }
  0x5a   :  { %3306 = vmatprep.subr.bf16.mxu1 %v3604_v25  ;;  %v3649_v24 = vld [vmem:[%s4676_s1 + $0x330] sm:$0xff]  }
  0x5b   :  { %v3650_v25 = vld [vmem:[%s4676_s1 + $0x3b0] sm:$0xff]  }
  0x5c   :  { %3285 = vmatpush3.bf16.msra.mxu0 %v3605_v26  ;;  %v3651_v26 = vld [vmem:[%s4676_s1 + $0x378] sm:$0xff]  }
  0x5d   :  { %3307 = vmatpush3.bf16.msra.mxu1 %v3606_v27  ;;  %3286 = vmatprep.subr.bf16.mxu0 %v3607_v28  ;;  %v3652_v27 = vld [vmem:[%s4676_s1 + $0x3f8] sm:$0xff]  }
  0x5e   :  { %3308 = vmatprep.subr.bf16.mxu1 %v3608_v29  ;;  %v3653_v28 = vld [vmem:[%s4676_s1 + $0x338] sm:$0xff]  }
  0x5f   :  { %v3654_v29 = vld [vmem:[%s4676_s1 + $0x3b8] sm:$0xff]  }
  0x60   :  { %3287 = vmatpush3.bf16.msra.mxu0 %v3609_v30  ;;  %v3655_v30 = vld [vmem:[%s4675_s0 + $0x18] ss:$48 sps:$4 sm:$0xff]  }
  0x61   :  { %3309 = vmatpush3.bf16.msra.mxu1 %v3610_v31  ;;  %3316 = vmatprep.subr.bf16.mxu0 %v3623_v49  ;;  %v3657_v31 = vld [vmem:[%s4675_s0 + $0x78] ss:$48 sps:$4 sm:$0xff]   ;;  %v248_v37 = vrot.slane %v3655_v30, %v3960_v43  ;;  %v485_v49 = vrot.slane %v3666_v41, %v3960_v43  ;;  %v3703_v30 = vld [vmem:[%s4675_s0 + $0xe0] ss:$48 sps:$4 sm:$0xff]   ;;  %v291_v41 = vrot.slane %v3707_v32, %v3960_v43  ;;  %v3752_v32 = vld [vmem:[%s4675_s0 + $0x8c] ss:$48 sps:$4 sm:$0xff]  }
  0x62   :  { %3338 = vmatprep.subr.bf16.mxu1 %v3624_v54  ;;  %v262_v38 = vrot.slane %v3657_v31, %v3960_v43  ;;  %v486_v54 = vcombine.low %v464_v39, %v478_v42  ;;  %v3705_v31 = vld [vmem:[%s4675_s0 + $0x140] ss:$48 sps:$4 sm:$0xff]   ;;  %v500_v39 = vrot.slane %v3703_v30, %v3960_v43 }
  0x63   :  { %2374 = vmatmul.mubr.bf16.vlgmr.msra.gmra.mrb[8].mxu0 %v618_v63  ;;  %v489_v57 = vcombine.high %v471_v48, %v485_v49  ;;  %v514_v40 = vrot.slane %v3705_v31, %v3960_v43  ;;  %v3711_v42 = vld [vmem:[%s4676_s1 + $0x540] sm:$0xff]   ;;  %v3751_v31 = vld [vmem:[%s4675_s0 + $0x2c] ss:$48 sps:$4 sm:$0xff]  }
  0x64   :  { %3317 = vmatpush3.bf16.msra.mxu0 %v3625_v58  ;;  %2415 = vmatmul.mubr.bf16.vlgmr.msra.gmra.mrb[8].mxu1 %v620_v2  ;;  %v271_v47 = vcombine.high %v248_v37, %v262_v38  ;;  %v270_v50 = vcombine.low %v248_v37, %v262_v38  ;;  %v488_v58 = vcombine.low %v471_v48, %v485_v49  ;;  %v3673_v2 = vld [vmem:[%s4676_s1 + $0x408] sm:$0xff]   ;;  %v3709_v37 = vld [vmem:[%s4675_s0 + $0xe4] ss:$48 sps:$4 sm:$0xff]  }
  0x65   :  { %3318 = vmatprep.subr.bf16.mxu0 %v3627_v0  ;;  %3339 = vmatpush3.bf16.msra.mxu1 %v3626_v62  ;;  %v3671_v62 = vld [vmem:[%s4676_s1 + $0x448] sm:$0xff]   ;;  %v625_v63 = vpack.c.bf16 %v489_v57, %v273_v53  ;;  %v3710_v38 = vld [vmem:[%s4675_s0 + $0x144] ss:$48 sps:$4 sm:$0xff]   ;;  %v523_v49 = vcombine.high %v500_v39, %v514_v40  ;;  %v309_v53 = vcombine.high %v291_v41, %v305_v45 }
  0x66   :  { %3340 = vmatprep.subr.bf16.mxu1 %v3628_v3  ;;  %v623_v60 = vpack.c.bf16 %v487_v52, %v271_v47  ;;  %v622_v61 = vpack.c.bf16 %v486_v54, %v270_v50  ;;  %v624_v0 = vpack.c.bf16 %v488_v58, %v272_v55  ;;  %v3674_v3 = vld [vmem:[%s4676_s1 + $0x488] sm:$0xff]   ;;  %v521_v47 = vrot.slane %v3710_v38, %v3960_v43  ;;  %v3712_v48 = vld [vmem:[%s4676_s1 + $0x5c0] sm:$0xff]  }
  0x67   :  { %2496 = vmatprep.mubr.bf16.mxu1 %v625_v63  ;;  %v3713_v52 = vld [vmem:[%s4676_s1 + $0x500] sm:$0xff]   ;;  %v308_v55 = vcombine.low %v291_v41, %v305_v45  ;;  %v3716_v63 = vld [vmem:[%s4676_s1 + $0x5c8] sm:$0xff]  }
  0x68   :  { %3319 = vmatpush3.bf16.msra.mxu0 %v3629_v4  ;;  %2455 = vmatprep.mubr.bf16.mxu0 %v623_v60  ;;  %v3675_v4 = vld [vmem:[%s4676_s1 + $0x450] sm:$0xff]   ;;  %v3714_v57 = vld [vmem:[%s4676_s1 + $0x580] sm:$0xff]   ;;  %v3715_v60 = vld [vmem:[%s4676_s1 + $0x548] sm:$0xff]  }
  0x69   :  { %3320 = vmatprep.subr.bf16.mxu0 %v3631_v6  ;;  %3341 = vmatpush3.bf16.msra.mxu1 %v3630_v5  ;;  %v3676_v5 = vld [vmem:[%s4676_s1 + $0x4d0] sm:$0xff]   ;;  %v3754_v38 = vld [vmem:[%s4675_s0 + $0x14c] ss:$48 sps:$4 sm:$0xff]  }
  0x6a   :  { %3342 = vmatprep.subr.bf16.mxu1 %v3632_v7  ;;  %v3677_v6 = vld [vmem:[%s4676_s1 + $0x410] sm:$0xff]   ;;  %v557_v45 = vrot.slane %v3754_v38, %v3960_v43 }
  0x6b   :  { %v3678_v7 = vld [vmem:[%s4676_s1 + $0x490] sm:$0xff]  }
  0x6c   :  { %3321 = vmatpush3.bf16.msra.mxu0 %v3633_v8  ;;  %v3679_v8 = vld [vmem:[%s4676_s1 + $0x458] sm:$0xff]  }
  0x6d   :  { %3322 = vmatprep.subr.bf16.mxu0 %v3635_v10  ;;  %3343 = vmatpush3.bf16.msra.mxu1 %v3634_v9  ;;  %v3680_v9 = vld [vmem:[%s4676_s1 + $0x4d8] sm:$0xff]  }
  0x6e   :  { %3344 = vmatprep.subr.bf16.mxu1 %v3636_v11  ;;  %v3681_v10 = vld [vmem:[%s4676_s1 + $0x418] sm:$0xff]  }
  0x6f   :  { %v3682_v11 = vld [vmem:[%s4676_s1 + $0x498] sm:$0xff]  }
  0x70   :  { %3323 = vmatpush3.bf16.msra.mxu0 %v3637_v12  ;;  %v3683_v12 = vld [vmem:[%s4676_s1 + $0x460] sm:$0xff]  }
  0x71   :  { %3324 = vmatprep.subr.bf16.mxu0 %v3639_v14  ;;  %3345 = vmatpush3.bf16.msra.mxu1 %v3638_v13  ;;  %v3684_v13 = vld [vmem:[%s4676_s1 + $0x4e0] sm:$0xff]  }
  0x72   :  { %3346 = vmatprep.subr.bf16.mxu1 %v3640_v15  ;;  %v3685_v14 = vld [vmem:[%s4676_s1 + $0x420] sm:$0xff]  }
  0x73   :  { %v3686_v15 = vld [vmem:[%s4676_s1 + $0x4a0] sm:$0xff]  }
  0x74   :  { %3325 = vmatpush3.bf16.msra.mxu0 %v3641_v16  ;;  %v3687_v16 = vld [vmem:[%s4676_s1 + $0x468] sm:$0xff]  }
  0x75   :  { %3326 = vmatprep.subr.bf16.mxu0 %v3643_v18  ;;  %3347 = vmatpush3.bf16.msra.mxu1 %v3642_v17  ;;  %v3688_v17 = vld [vmem:[%s4676_s1 + $0x4e8] sm:$0xff]  }
  0x76   :  { %3348 = vmatprep.subr.bf16.mxu1 %v3644_v19  ;;  %v3689_v18 = vld [vmem:[%s4676_s1 + $0x428] sm:$0xff]  }
  0x77   :  { %v3690_v19 = vld [vmem:[%s4676_s1 + $0x4a8] sm:$0xff]  }
  0x78   :  { %3327 = vmatpush3.bf16.msra.mxu0 %v3645_v20  ;;  %v3691_v20 = vld [vmem:[%s4676_s1 + $0x470] sm:$0xff]  }
  0x79   :  { %3328 = vmatprep.subr.bf16.mxu0 %v3647_v22  ;;  %3349 = vmatpush3.bf16.msra.mxu1 %v3646_v21  ;;  %v3692_v21 = vld [vmem:[%s4676_s1 + $0x4f0] sm:$0xff]  }
  0x7a   :  { %3350 = vmatprep.subr.bf16.mxu1 %v3648_v23  ;;  %v3693_v22 = vld [vmem:[%s4676_s1 + $0x430] sm:$0xff]  }
  0x7b   :  { %v3694_v23 = vld [vmem:[%s4676_s1 + $0x4b0] sm:$0xff]  }
  0x7c   :  { %3329 = vmatpush3.bf16.msra.mxu0 %v3649_v24  ;;  %v3695_v24 = vld [vmem:[%s4676_s1 + $0x478] sm:$0xff]  }
  0x7d   :  { %3330 = vmatprep.subr.bf16.mxu0 %v3651_v26  ;;  %3351 = vmatpush3.bf16.msra.mxu1 %v3650_v25  ;;  %v3696_v25 = vld [vmem:[%s4676_s1 + $0x4f8] sm:$0xff]  }
  0x7e   :  { %3352 = vmatprep.subr.bf16.mxu1 %v3652_v27  ;;  %v3697_v26 = vld [vmem:[%s4676_s1 + $0x438] sm:$0xff]  }
  0x7f   :  { %v3698_v27 = vld [vmem:[%s4676_s1 + $0x4b8] sm:$0xff]  }
  0x80   :  { %3331 = vmatpush3.bf16.msra.mxu0 %v3653_v28  ;;  %v3699_v28 = vld [vmem:[%s4675_s0 + $0x20] ss:$48 sps:$4 sm:$0xff]  }
  0x81   :  { %3353 = vmatpush3.bf16.msra.mxu1 %v3654_v29  ;;  %3360 = vmatprep.subr.bf16.mxu0 %v3667_v46  ;;  %v3701_v29 = vld [vmem:[%s4675_s0 + $0x80] ss:$48 sps:$4 sm:$0xff]   ;;  %v284_v33 = vrot.slane %v3699_v28, %v3960_v43  ;;  %v507_v46 = vrot.slane %v3709_v37, %v3960_v43  ;;  %v3747_v28 = vld [vmem:[%s4675_s0 + $0xe8] ss:$48 sps:$4 sm:$0xff]  }
  0x82   :  { %3382 = vmatprep.subr.bf16.mxu1 %v3668_v51  ;;  %v298_v34 = vrot.slane %v3701_v29, %v3960_v43  ;;  %v522_v51 = vcombine.low %v500_v39, %v514_v40  ;;  %v3749_v29 = vld [vmem:[%s4675_s0 + $0x148] ss:$48 sps:$4 sm:$0xff]   ;;  %v536_v36 = vrot.slane %v3747_v28, %v3960_v43  ;;  %v327_v39 = vrot.slane %v3751_v31, %v3960_v43 }
  0x83   :  { %2456 = vmatmul.mubr.bf16.vlgmr.msra.gmra.mrb[12].mxu0 %v622_v61  ;;  %v525_v54 = vcombine.high %v507_v46, %v521_v47  ;;  %v550_v37 = vrot.slane %v3749_v29, %v3960_v43  ;;  %v341_v40 = vrot.slane %v3752_v32, %v3960_v43  ;;  %v3758_v28 = vld [vmem:[%s4678_s3 + $0x18] sm:$0xff]  }
  0x84   :  { %2497 = vmatmul.mubr.bf16.vlgmr.msra.gmra.mrb[12].mxu1 %v624_v0  ;;  %3361 = vmatpush3.bf16.msra.mxu0 %v3669_v56  ;;  %v307_v44 = vcombine.high %v284_v33, %v298_v34  ;;  %v306_v50 = vcombine.low %v284_v33, %v298_v34  ;;  %v524_v56 = vcombine.low %v507_v46, %v521_v47  ;;  %v3717_v0 = vld [vmem:[%s4676_s1 + $0x508] sm:$0xff]  }
  0x85   :  { %3383 = vmatpush3.bf16.msra.mxu1 %v3670_v59  ;;  %3362 = vmatprep.subr.bf16.mxu0 %v3671_v62  ;;  %v629_v61 = vpack.c.bf16 %v525_v54, %v309_v53  ;;  %v3753_v33 = vld [vmem:[%s4675_s0 + $0xec] ss:$48 sps:$4 sm:$0xff]   ;;  %v345_v47 = vcombine.high %v327_v39, %v341_v40 }
  0x86   :  { %3384 = vmatprep.subr.bf16.mxu1 %v3672_v1  ;;  %v627_v58 = vpack.c.bf16 %v523_v49, %v307_v44  ;;  %v626_v59 = vpack.c.bf16 %v522_v51, %v306_v50  ;;  %v628_v62 = vpack.c.bf16 %v524_v56, %v308_v55  ;;  %v3718_v1 = vld [vmem:[%s4676_s1 + $0x588] sm:$0xff]   ;;  %v543_v41 = vrot.slane %v3753_v33, %v3960_v43 }
  0x87   :  { %2578 = vmatprep.mubr.bf16.mxu1 %v629_v61  ;;  %v559_v44 = vcombine.high %v536_v36, %v550_v37  ;;  %v344_v49 = vcombine.low %v327_v39, %v341_v40 }
  0x88   :  { %3363 = vmatpush3.bf16.msra.mxu0 %v3673_v2  ;;  %2537 = vmatprep.mubr.bf16.mxu0 %v627_v58  ;;  %v3719_v2 = vld [vmem:[%s4676_s1 + $0x550] sm:$0xff]   ;;  %v561_v51 = vcombine.high %v543_v41, %v557_v45 }
  0x89   :  { %3385 = vmatpush3.bf16.msra.mxu1 %v3674_v3  ;;  %3364 = vmatprep.subr.bf16.mxu0 %v3675_v4  ;;  %v3720_v3 = vld [vmem:[%s4676_s1 + $0x5d0] sm:$0xff]  }
  0x8a   :  { %3386 = vmatprep.subr.bf16.mxu1 %v3676_v5  ;;  %v3721_v4 = vld [vmem:[%s4676_s1 + $0x510] sm:$0xff]   ;;  %v633_v54 = vpack.c.bf16 %v561_v51, %v345_v47 }
  0x8b   :  { %v3722_v5 = vld [vmem:[%s4676_s1 + $0x590] sm:$0xff]  }
  0x8c   :  { %3365 = vmatpush3.bf16.msra.mxu0 %v3677_v6  ;;  %v3723_v6 = vld [vmem:[%s4676_s1 + $0x558] sm:$0xff]  }
  0x8d   :  { %3387 = vmatpush3.bf16.msra.mxu1 %v3678_v7  ;;  %3366 = vmatprep.subr.bf16.mxu0 %v3679_v8  ;;  %v3724_v7 = vld [vmem:[%s4676_s1 + $0x5d8] sm:$0xff]  }
  0x8e   :  { %3388 = vmatprep.subr.bf16.mxu1 %v3680_v9  ;;  %v3725_v8 = vld [vmem:[%s4676_s1 + $0x518] sm:$0xff]  }
  0x8f   :  { %v3726_v9 = vld [vmem:[%s4676_s1 + $0x598] sm:$0xff]  }
  0x90   :  { %3367 = vmatpush3.bf16.msra.mxu0 %v3681_v10  ;;  %v3727_v10 = vld [vmem:[%s4676_s1 + $0x560] sm:$0xff]  }
  0x91   :  { %3389 = vmatpush3.bf16.msra.mxu1 %v3682_v11  ;;  %3368 = vmatprep.subr.bf16.mxu0 %v3683_v12  ;;  %v3728_v11 = vld [vmem:[%s4676_s1 + $0x5e0] sm:$0xff]  }
  0x92   :  { %3390 = vmatprep.subr.bf16.mxu1 %v3684_v13  ;;  %v3729_v12 = vld [vmem:[%s4676_s1 + $0x520] sm:$0xff]  }
  0x93   :  { %v3730_v13 = vld [vmem:[%s4676_s1 + $0x5a0] sm:$0xff]  }
  0x94   :  { %3369 = vmatpush3.bf16.msra.mxu0 %v3685_v14  ;;  %v3731_v14 = vld [vmem:[%s4676_s1 + $0x568] sm:$0xff]  }
  0x95   :  { %3391 = vmatpush3.bf16.msra.mxu1 %v3686_v15  ;;  %3370 = vmatprep.subr.bf16.mxu0 %v3687_v16  ;;  %v3732_v15 = vld [vmem:[%s4676_s1 + $0x5e8] sm:$0xff]  }
  0x96   :  { %3392 = vmatprep.subr.bf16.mxu1 %v3688_v17  ;;  %v3733_v16 = vld [vmem:[%s4676_s1 + $0x528] sm:$0xff]  }
  0x97   :  { %v3734_v17 = vld [vmem:[%s4676_s1 + $0x5a8] sm:$0xff]  }
  0x98   :  { %3371 = vmatpush3.bf16.msra.mxu0 %v3689_v18  ;;  %v3735_v18 = vld [vmem:[%s4676_s1 + $0x570] sm:$0xff]  }
  0x99   :  { %3393 = vmatpush3.bf16.msra.mxu1 %v3690_v19  ;;  %3372 = vmatprep.subr.bf16.mxu0 %v3691_v20  ;;  %v3736_v19 = vld [vmem:[%s4676_s1 + $0x5f0] sm:$0xff]  }
  0x9a   :  { %3394 = vmatprep.subr.bf16.mxu1 %v3692_v21  ;;  %v3737_v20 = vld [vmem:[%s4676_s1 + $0x530] sm:$0xff]  }
  0x9b   :  { %v3738_v21 = vld [vmem:[%s4676_s1 + $0x5b0] sm:$0xff]  }
  0x9c   :  { %3373 = vmatpush3.bf16.msra.mxu0 %v3693_v22  ;;  %v3739_v22 = vld [vmem:[%s4676_s1 + $0x578] sm:$0xff]  }
  0x9d   :  { %3395 = vmatpush3.bf16.msra.mxu1 %v3694_v23  ;;  %3374 = vmatprep.subr.bf16.mxu0 %v3695_v24  ;;  %v3740_v23 = vld [vmem:[%s4676_s1 + $0x5f8] sm:$0xff]  }
  0x9e   :  { %3396 = vmatprep.subr.bf16.mxu1 %v3696_v25  ;;  %v3741_v24 = vld [vmem:[%s4676_s1 + $0x538] sm:$0xff]  }
  0x9f   :  { %v3742_v25 = vld [vmem:[%s4676_s1 + $0x5b8] sm:$0xff]  }
  0xa0   :  { %3375 = vmatpush3.bf16.msra.mxu0 %v3697_v26  ;;  %v3743_v26 = vld [vmem:[%s4675_s0 + $0x28] ss:$48 sps:$4 sm:$0xff]  }
  0xa1   :  { %3397 = vmatpush3.bf16.msra.mxu1 %v3698_v27  ;;  %3404 = vmatprep.subr.bf16.mxu0 %v3711_v42  ;;  %v3745_v27 = vld [vmem:[%s4675_s0 + $0x88] ss:$48 sps:$4 sm:$0xff]   ;;  %v320_v30 = vrot.slane %v3743_v26, %v3960_v43 }
  0xa2   :  { %3426 = vmatprep.subr.bf16.mxu1 %v3712_v48  ;;  %v334_v34 = vrot.slane %v3745_v27, %v3960_v43  ;;  %v558_v48 = vcombine.low %v536_v36, %v550_v37  ;;  %v2973_v43 = vld [vmem:[%s4677_s2] ss:$0 sm:$0xff]  ;;  %v3756_v26 = vld [vmem:[%s4678_s3 + $0x8] sm:$0xff]   ;;  %v3757_v27 = vld [vmem:[%s4678_s3 + $0x10] sm:$0xff]  }
  0xa3   :  { %2538 = vmatmul.mubr.bf16.vlgmr.msra.gmra.mrb[16].mxu0 %v626_v59 }
  0xa4   :  { %2579 = vmatmul.mubr.bf16.vlgmr.msra.gmra.mrb[16].mxu1 %v628_v62  ;;  %3405 = vmatpush3.bf16.msra.mxu0 %v3713_v52  ;;  %v343_v42 = vcombine.high %v320_v30, %v334_v34  ;;  %v342_v46 = vcombine.low %v320_v30, %v334_v34  ;;  %v560_v52 = vcombine.low %v543_v41, %v557_v45 }
  0xa5   :  { %3427 = vmatpush3.bf16.msra.mxu1 %v3714_v57  ;;  %3406 = vmatprep.subr.bf16.mxu0 %v3715_v60 }
  0xa6   :  { %3428 = vmatprep.subr.bf16.mxu1 %v3716_v63  ;;  %v631_v50 = vpack.c.bf16 %v559_v44, %v343_v42  ;;  %v630_v53 = vpack.c.bf16 %v558_v48, %v342_v46  ;;  %v632_v55 = vpack.c.bf16 %v560_v52, %v344_v49  ;;  %2660 = vmatprep.mubr.bf16.mxu1 %v633_v54 }
  0xa8   :  { %3407 = vmatpush3.bf16.msra.mxu0 %v3717_v0  ;;  %2619 = vmatprep.mubr.bf16.mxu0 %v631_v50 }
  0xa9   :  { %3429 = vmatpush3.bf16.msra.mxu1 %v3718_v1  ;;  %3408 = vmatprep.subr.bf16.mxu0 %v3719_v2 }
  0xaa   :  { %3430 = vmatprep.subr.bf16.mxu1 %v3720_v3 }
  0xac   :  { %3409 = vmatpush3.bf16.msra.mxu0 %v3721_v4 }
  0xad   :  { %3431 = vmatpush3.bf16.msra.mxu1 %v3722_v5  ;;  %3410 = vmatprep.subr.bf16.mxu0 %v3723_v6 }
  0xae   :  { %3432 = vmatprep.subr.bf16.mxu1 %v3724_v7 }
  0xb0   :  { %3411 = vmatpush3.bf16.msra.mxu0 %v3725_v8  ;;  %v3755_v8 = vld [vmem:[%s4678_s3] sm:$0xff]  }
  0xb1   :  { %3433 = vmatpush3.bf16.msra.mxu1 %v3726_v9  ;;  %3412 = vmatprep.subr.bf16.mxu0 %v3727_v10  ;;  %v3787_v9 = vmov 0.0  }
  0xb2   :  { %3434 = vmatprep.subr.bf16.mxu1 %v3728_v11 }
  0xb4   :  { %3413 = vmatpush3.bf16.msra.mxu0 %v3729_v12 }
  0xb5   :  { %3435 = vmatpush3.bf16.msra.mxu1 %v3730_v13  ;;  %3414 = vmatprep.subr.bf16.mxu0 %v3731_v14 }
  0xb6   :  { %3436 = vmatprep.subr.bf16.mxu1 %v3732_v15 }
  0xb8   :  { %3415 = vmatpush3.bf16.msra.mxu0 %v3733_v16 }
  0xb9   :  { %3437 = vmatpush3.bf16.msra.mxu1 %v3734_v17  ;;  %3416 = vmatprep.subr.bf16.mxu0 %v3735_v18 }
  0xba   :  { %3438 = vmatprep.subr.bf16.mxu1 %v3736_v19 }
  0xbc   :  { %3417 = vmatpush3.bf16.msra.mxu0 %v3737_v20 }
  0xbd   :  { %3439 = vmatpush3.bf16.msra.mxu1 %v3738_v21  ;;  %3418 = vmatprep.subr.bf16.mxu0 %v3739_v22 }
  0xbe   :  { %3440 = vmatprep.subr.bf16.mxu1 %v3740_v23 }
  0xc0   :  { %3419 = vmatpush3.bf16.msra.mxu0 %v3741_v24 }
  0xc1   :  { %3441 = vmatpush3.bf16.msra.mxu1 %v3742_v25  ;;  %3458 = vmatprep.subr.bf16.mxu0 %v3787_v9 }
  0xc2   :  { %3470 = vmatprep.subr.bf16.mxu1 %v3787_v9 }
  0xc3   :  { %2620 = vmatmul.mubr.bf16.vlgmr.msra.gmra.mrb[20].mxu0 %v630_v53 }
  0xc4   :  { %2661 = vmatmul.mubr.bf16.vlgmr.msra.gmra.mrb[20].mxu1 %v632_v55  ;;  %3459 = vmatpush3.bf16.msra.mxu0 %v3755_v8 }
  0xc5   :  { %3460 = vmatprep.subr.bf16.mxu0 %v3787_v9  ;;  %3466 = vmatprep.mubr.msk.bf16.mxu0 %vm3788_vm0, %v3787_v9 }
  0xc6   :  { %3474 = vmatprep.mubr.msk.bf16.mxu1 %vm3788_vm0, %v3787_v9 }
  0xc8   :  { %3461 = vmatpush3.bf16.msra.mxu0 %v3756_v26 }
  0xc9   :  { %3462 = vmatprep.subr.bf16.mxu0 %v3787_v9 }
  0xcc   :  { %3463 = vmatpush3.bf16.msra.mxu0 %v3757_v27 }
  0xcd   :  { %3464 = vmatprep.subr.bf16.mxu0 %v3787_v9 }
  0xd0   :  { %3465 = vmatpush3.bf16.msra.mxu0 %v3758_v28 }
  0xf6   :  { %v3200_v56 = vpop.f32.mrb[0].mxu0 }
  0xf7   :  { %v3222_v57 = vpop.f32.mrb[0].mxu1  ;;  %v3201_v58 = vpop.f32.mrb[1].mxu0 }
  0xf8   :  { %v3202_v59 = vadd.f32 %v3201_v58, %v3200_v56  ;;  %v3223_v60 = vpop.f32.mrb[1].mxu1  ;;  %v3203_v61 = vpop.f32.mrb[2].mxu0 }
  0xf9   :  { %v3224_v62 = vadd.f32 %v3223_v60, %v3222_v57  ;;  %v3225_v63 = vpop.f32.mrb[2].mxu1  ;;  %v3204_v0 = vpop.f32.mrb[3].mxu0 }
  0xfa   :  { %v2212_v1 = vadd.f32 %v3202_v59, %v2973_v43  ;;  %v3205_v2 = vadd.f32 %v3204_v0, %v3203_v61  ;;  %v3226_v3 = vpop.f32.mrb[3].mxu1 }
  0xfb   :  { %v3227_v4 = vadd.f32 %v3226_v3, %v3225_v63 }
  0xfc   :  { %v2253_v5 = vadd.f32 %v3224_v62, %v2212_v1  ;;  %v2215_v6 = vadd.f32 %v3205_v2, %v2973_v43 }
  0xfe   :  { %v2256_v7 = vadd.f32 %v3227_v4, %v2215_v6 }
 0x116   :  { %v3244_v10 = vpop.f32.mrb[4].mxu0 }
 0x117   :  { %v3266_v11 = vpop.f32.mrb[4].mxu1  ;;  %v3245_v12 = vpop.f32.mrb[5].mxu0 }
 0x118   :  { %v3246_v13 = vadd.f32 %v3245_v12, %v3244_v10  ;;  %v3267_v14 = vpop.f32.mrb[5].mxu1  ;;  %v3247_v15 = vpop.f32.mrb[6].mxu0 }
 0x119   :  { %v3268_v16 = vadd.f32 %v3267_v14, %v3266_v11  ;;  %v3269_v17 = vpop.f32.mrb[6].mxu1  ;;  %v3248_v18 = vpop.f32.mrb[7].mxu0 }
 0x11a   :  { %v2294_v19 = vadd.f32 %v3246_v13, %v2253_v5  ;;  %v3249_v20 = vadd.f32 %v3248_v18, %v3247_v15  ;;  %v3270_v21 = vpop.f32.mrb[7].mxu1 }
 0x11b   :  { %v3271_v22 = vadd.f32 %v3270_v21, %v3269_v17 }
 0x11c   :  { %v2335_v23 = vadd.f32 %v3268_v16, %v2294_v19  ;;  %v2297_v24 = vadd.f32 %v3249_v20, %v2256_v7 }
 0x11e   :  { %v2338_v25 = vadd.f32 %v3271_v22, %v2297_v24 }
 0x136   :  { %v3288_v29 = vpop.f32.mrb[8].mxu0 }
 0x137   :  { %v3289_v30 = vpop.f32.mrb[9].mxu0  ;;  %v3310_v31 = vpop.f32.mrb[8].mxu1 }
 0x138   :  { %v3290_v32 = vadd.f32 %v3289_v30, %v3288_v29  ;;  %v3291_v33 = vpop.f32.mrb[10].mxu0  ;;  %v3311_v34 = vpop.f32.mrb[9].mxu1 }
 0x139   :  { %v3292_v36 = vpop.f32.mrb[11].mxu0  ;;  %v3312_v38 = vadd.f32 %v3311_v34, %v3310_v31  ;;  %v3313_v39 = vpop.f32.mrb[10].mxu1  ;;  %v3759_v34 = vld [vmem:[%s4680_s5] sm:$0xff]  }
 0x13a   :  { %v2376_v37 = vadd.f32 %v3290_v32, %v2335_v23  ;;  %v3293_v40 = vadd.f32 %v3292_v36, %v3291_v33  ;;  %v3314_v41 = vpop.f32.mrb[11].mxu1  ;;  %3471 = vmatpush3.bf16.msra.mxu1 %v3759_v34  ;;  %v3760_v36 = vld [vmem:[%s4680_s5 + $0x8] sm:$0xff]  }
 0x13b   :  { %v3315_v45 = vadd.f32 %v3314_v41, %v3313_v39  ;;  %3472 = vmatprep.subr.bf16.mxu1 %v3787_v9 }
 0x13c   :  { %v2417_v42 = vadd.f32 %v3312_v38, %v2376_v37  ;;  %v2379_v44 = vadd.f32 %v3293_v40, %v2338_v25  ;;  %v3166_v37 = vld [vmem:[%s4679_s4] ss:$0 sm:$0xff] }
 0x13e   :  { %v2420_v46 = vadd.f32 %v3315_v45, %v2379_v44  ;;  %3473 = vmatpush3.bf16.msra.mxu1 %v3760_v36 }
 0x13f   :  { %3478 = vmatprep.subr.bf16.mxu1 %v3787_v9 }
 0x156   :  { %v3332_v47 = vpop.f32.mrb[12].mxu0 }
 0x157   :  { %v3354_v48 = vpop.f32.mrb[12].mxu1  ;;  %v3333_v49 = vpop.f32.mrb[13].mxu0 }
 0x158   :  { %v3334_v50 = vadd.f32 %v3333_v49, %v3332_v47  ;;  %v3355_v51 = vpop.f32.mrb[13].mxu1  ;;  %v3335_v52 = vpop.f32.mrb[14].mxu0  ;;  %v3172_v49 = vld [vmem:[%s4681_s6] ss:$0 sm:$0xff] }
 0x159   :  { %v3356_v53 = vadd.f32 %v3355_v51, %v3354_v48  ;;  %v3357_v54 = vpop.f32.mrb[14].mxu1  ;;  %v3336_v55 = vpop.f32.mrb[15].mxu0  ;;  %v3761_v48 = vld [vmem:[%s4682_s7] sm:$0xff]  }
 0x15a   :  { %v2458_v56 = vadd.f32 %v3334_v50, %v2417_v42  ;;  %v3337_v57 = vadd.f32 %v3336_v55, %v3335_v52  ;;  %v3358_v43 = vpop.f32.mrb[15].mxu1 }
 0x15b   :  { %v3359_v58 = vadd.f32 %v3358_v43, %v3357_v54 }
 0x15c   :  { %v2499_v59 = vadd.f32 %v3356_v53, %v2458_v56  ;;  %v2461_v60 = vadd.f32 %v3337_v57, %v2420_v46 }
 0x15e   :  { %v2502_v61 = vadd.f32 %v3359_v58, %v2461_v60  ;;  %v3176_v60 = vld [vmem:[%s4683_s8] ss:$0 sm:$0xff] }
 0x176   :  { %v3376_v62 = vpop.f32.mrb[16].mxu0 }
 0x177   :  { %v3398_v63 = vpop.f32.mrb[16].mxu1  ;;  %v3377_v0 = vpop.f32.mrb[17].mxu0 }
 0x178   :  { %v3378_v1 = vadd.f32 %v3377_v0, %v3376_v62  ;;  %v3399_v2 = vpop.f32.mrb[17].mxu1  ;;  %v3379_v3 = vpop.f32.mrb[18].mxu0 }
 0x179   :  { %v3400_v4 = vadd.f32 %v3399_v2, %v3398_v63  ;;  %v3401_v5 = vpop.f32.mrb[18].mxu1  ;;  %v3380_v6 = vpop.f32.mrb[19].mxu0 }
 0x17a   :  { %v2540_v7 = vadd.f32 %v3378_v1, %v2499_v59  ;;  %v3381_v8 = vadd.f32 %v3380_v6, %v3379_v3  ;;  %v3402_v10 = vpop.f32.mrb[19].mxu1 }
 0x17b   :  { %v3403_v11 = vadd.f32 %v3402_v10, %v3401_v5 }
 0x17c   :  { %v2581_v12 = vadd.f32 %v3400_v4, %v2540_v7  ;;  %v2543_v13 = vadd.f32 %v3381_v8, %v2502_v61 }
 0x17e   :  { %v2584_v14 = vadd.f32 %v3403_v11, %v2543_v13 }
 0x196   :  { %v3420_v15 = vpop.f32.mrb[20].mxu0 }
 0x197   :  { %v3421_v16 = vpop.f32.mrb[21].mxu0  ;;  %v3442_v17 = vpop.f32.mrb[20].mxu1 }
 0x198   :  { %v3422_v18 = vadd.f32 %v3421_v16, %v3420_v15  ;;  %v3423_v19 = vpop.f32.mrb[22].mxu0  ;;  %v3443_v20 = vpop.f32.mrb[21].mxu1 }
 0x199   :  { %v3424_v21 = vpop.f32.mrb[23].mxu0  ;;  %v3444_v23 = vadd.f32 %v3443_v20, %v3442_v17  ;;  %v3445_v24 = vpop.f32.mrb[22].mxu1 }
 0x19a   :  { %v2622_v22 = vadd.f32 %v3422_v18, %v2581_v12  ;;  %v3425_v25 = vadd.f32 %v3424_v21, %v3423_v19  ;;  %v3446_v26 = vpop.f32.mrb[23].mxu1 }
 0x19b   :  { %v3447_v29 = vadd.f32 %v3446_v26, %v3445_v24 }
 0x19c   :  { %v2663_v27 = vadd.f32 %v3444_v23, %v2622_v22  ;;  %v2625_v28 = vadd.f32 %v3425_v25, %v2584_v14 }
 0x19e   :  { %v2666_v30 = vadd.f32 %v3447_v29, %v2625_v28  ;;  %v2669_v31 = vmax.f32 %v2663_v27, 0.0 }
 0x1a0   :  { %v2670_v32 = vmax.f32 %v2666_v30, 0.0 }
 0x1a2   :  { %v2671_v33 = vpack.c.bf16 %v2670_v32, %v2669_v31 }
 0x1a4   :  { %3467 = vmatmul.mubr.msk.bf16.vlgmr.msra.gmra.mrb[24].mxu0 %vm2711_vm1, %v2671_v33 }
 0x277   :  { %v2749_v38 = vpop.f32.mrb[24].mxu0 }
 0x278   :  { %v2750_v39 = vadd.f32 %v3166_v37, %v2749_v38  ;;  %v3468_v40 = vpop.f32.mrb[25].mxu0 }
 0x279   :  { %v2752_v41 = vpop.f32.mrb[26].mxu0 }
 0x27a   :  { %v2753_v42 = vadd.f32 %v3166_v37, %v2752_v41  ;;  %v3469_v44 = vpop.f32.mrb[27].mxu0  ;;  %v2756_v45 = vmax.f32 %v2750_v39, 0.0 }
 0x27c   :  { %v2757_v46 = vmax.f32 %v2753_v42, 0.0 }
 0x27e   :  { %v2758_v47 = vpack.c.bf16 %v2757_v46, %v2756_v45 }
 0x280   :  { %3475 = vmatmul.mubr.msk.bf16.vlgmr.msra.gmra.mrb[24].mxu1 %vm2782_vm2, %v2758_v47 }
 0x281   :  { %3480 = vmatprep.mubr.msk.bf16.mxu1 %vm3788_vm0, %v3787_v9  ;;  %3479 = vmatpush3.bf16.msra.mxu1 %v3761_v48  ;;  %v3789_v9 = vmov 1966171168  }
 0x282   :  { %v2894_v58 = vunpack.c.l.s4 %v3789_v9 }
 0x284   :  { %v2895_v59 = vunpack.c.0.s8 %v2894_v58 }
 0x286   :  { %v2898_v2 = vsub.s32 %v2895_v59, %v3939_v35 }
 0x353   :  { %v2820_v50 = vpop.f32.mrb[24].mxu1 }
 0x354   :  { %v2821_v51 = vadd.f32 %v3172_v49, %v2820_v50  ;;  %v3476_v52 = vpop.f32.mrb[25].mxu1 }
 0x355   :  { %v2823_v53 = vpop.f32.mrb[26].mxu1 }
 0x356   :  { %v2824_v54 = vadd.f32 %v3172_v49, %v2823_v53  ;;  %v3477_v55 = vpop.f32.mrb[27].mxu1  ;;  %v2827_v56 = vmax.f32 %v2821_v51, 0.0 }
 0x358   :  { %v2828_v57 = vmax.f32 %v2824_v54, 0.0 }
 0x35a   :  { %v2829_v43 = vpack.c.bf16 %v2828_v57, %v2827_v56 }
 0x35c   :  { %3481 = vmatmul.mubr.msk.bf16.vlgmr.msra.gmra.mrb[28].mxu1 %vm2845_vm3, %v2829_v43 }
 0x42f   :  { %v2883_v61 = vpop.f32.mrb[28].mxu1 }
 0x430   :  { %v3482_v62 = vpop.f32.mrb[29].mxu1  ;;  %v2884_v0 = vadd.f32 %v3176_v60, %v2883_v61 }
 0x431   :  { %v2886_v63 = vpop.f32.mrb[30].mxu1 }
 0x432   :  { %v2887_v1 = vadd.f32 %v3176_v60, %v2886_v63  ;;  %v3483_v3 = vpop.f32.mrb[31].mxu1 }
 0x434   :  { %v2890_v4 = vpack.c.bf16 %v2887_v1, %v2884_v0  ;;  %v3179_v5 = vpack.c.bf16 %v2887_v1, %v2887_v1 }
 0x436   :  { %v2899_v6 = vrot.slane %v2890_v4, %v2898_v2  ;;  %v2906_v7 = vrot.slane %v3179_v5, %v2898_v2 }
 0x438   :  { %v2907_v8 = vcombine.high %v2899_v6, %v2899_v6  ;;  %v2908_v10 = vcombine.high %v2906_v7, %v2906_v7  ;;  %v2915_v11 = vrot.slane %v2899_v6, %v2898_v2  ;;  %v2922_v12 = vrot.slane %v2906_v7, %v2898_v2  ;;  %3180 = vst.sshfl [vmem:[#allocation2] sm:$0x1 pattern:$0x73625140] %v2899_v6 }
 0x439   :  { %3182 = vst.sshfl [vmem:[#allocation2 + $0x4] sm:$0x1 pattern:$0x73625140] %v2906_v7 }
 0x43a   :  { %v2929_v13 = vrot.slane %v2907_v8, %v2898_v2  ;;  %v2936_v14 = vrot.slane %v2908_v10, %v2898_v2  ;;  %v2937_v15 = vcombine.high %v2915_v11, %v2915_v11  ;;  %v2938_v16 = vcombine.high %v2922_v12, %v2922_v12  ;;  %3181 = vst.sshfl [vmem:[#allocation2 + $0x1] sm:$0x1 pattern:$0x73625140] %v2907_v8 }
 0x43b   :  { %3183 = vst.sshfl [vmem:[#allocation2 + $0x5] sm:$0x1 pattern:$0x73625140] %v2908_v10 }
 0x43c   :  { %v2939_v17 = vcombine.high %v2929_v13, %v2929_v13  ;;  %v2940_v18 = vcombine.high %v2936_v14, %v2936_v14  ;;  %2951 = vst [vmem:[#allocation2 + $0x2] sm:$0x1] %v2937_v15  ;;  %2955 = vst [vmem:[#allocation2 + $0x6] sm:$0x1] %v2938_v16 }
 0x43e   :  { %2952 = vst [vmem:[#allocation2 + $0x3] sm:$0x1] %v2939_v17  ;;  %2956 = vst [vmem:[#allocation2 + $0x7] sm:$0x1] %v2940_v18 }
 0x43f   :  { %2961 = vsyncadd [#allocation3], 112  ;;  %s3790_s6 = smov [#allocation2]  }
 0x440   :  { %s2962_s8 = sshll.u32 %s3790_s6, 4  ;;  %s2963_s8 = int_to_ptr.vmem [resolvable:$true] %s2962_s8 }
 0x441   :  { %s3762_s20 = scalar_lea.vmem %s2963_s8, 16  ;;  %s3766_s21 = scalar_lea.vmem %s2963_s8, 128 }
 0x442   :  { %p3763_p0 = scmp.ne.s32.totalorder %s2963_s8, %s3762_s20  ;;  %p3767_p1 = scmp.lt.s32.totalorder %s2963_s8, %s2963_s8 }
 0x443   :  { %p3768_p2 = scmp.lt.s32.totalorder %s3766_s21, %s3762_s20 }
 0x445   :  { %p3769_p3 = por %p3768_p2, %p3767_p1 }
 0x447   :  { %p3770_p4 = pnand %p3769_p3, %p3763_p0 }
 0x449   :  { %3773 = shalt.err (!%p3770_p4)
}
 0x44a   :  { %s3774_s24 = scalar_lea.hbm %s4684_s9, 16 }
 0x44b   :  { %p3775_p5 = scmp.ne.s32.totalorder %s4684_s9, %s3774_s24  ;;  %p3778_p6 = scmp.lt.u32.totalorder %s3774_s24, %s4684_s9 }
 0x44d   :  { %p3780_p7 = pnand %p3778_p6, %p3775_p5 }
 0x44f   :  { %3783 = shalt.err (!%p3780_p7)
}
 0x450   :  { %s3791_s28 = smov 16   ;;  %s3792_s2 = smov 1  }
 0x451   :  { %2968 = dma.vmem_to_hbm [thread:$0]  %s2963_s8, 16, %s4684_s9, [#allocation3], %s3791_s28, %s3791_s28, %s3792_s2  }
 0x452   :  { %3784 = dma.done.wait [#allocation3], 128  }
 0x453   :  { %3785 = vsyncadd [#allocation3], 4294967168 }
 0x454   :  { %2972 = vsyncpa [#allocation3], 1 }

// kernel: tpu_custom_call.1
= control target key start
LH: loop header
LB: loop body
LE: loop exit
PB: predicated region body
PF: predicated region fallthrough
CT: control target
= control target key end

     0   :  { %14 = vsyncpa [#allocation3], 0  ;;  %v137_v29 = vlaneseq  ;;  %v3786_v33 = vmov 1983009808   ;;  %vm3788_vm0 = vmmov 0   ;;  %vm2711_vm1 = vcmask 523264   ;;  %s4675_s0 = inlined_call_operand.vmem [shape: f32[2,3072], index: 0, kind: input, shape index: {}]   ;;  %s4676_s1 = inlined_call_operand.vmem [shape: bf16[3072,64], index: 1, kind: input, shape index: {}]   ;;  %s4677_s2 = inlined_call_operand.vmem [shape: f32[1,64], index: 2, kind: input, shape index: {}]   ;;  %s4678_s3 = inlined_call_operand.vmem [shape: bf16[64,32], index: 3, kind: input, shape index: {}]   ;;  %s4679_s4 = inlined_call_operand.vmem [shape: f32[1,32], index: 4, kind: input, shape index: {}]   ;;  %s4680_s5 = inlined_call_operand.vmem [shape: bf16[32,16], index: 5, kind: input, shape index: {}]   ;;  %s4681_s6 = inlined_call_operand.vmem [shape: f32[1,16], index: 6, kind: input, shape index: {}]   ;;  %s4682_s7 = inlined_call_operand.vmem [shape: bf16[16,128], index: 7, kind: input, shape index: {}]   ;;  %s4683_s8 = inlined_call_operand.vmem [shape: f32[1,128], index: 8, kind: input, shape index: {}]   ;;  %s4684_s9 = inlined_call_operand.hbm [shape: bf16[2,128], index: 9, kind: output, shape index: {}]  }
   0x1   :  { %v3491_v0 = vld [vmem:[%s4676_s1 + $0x40] sm:$0xff]   ;;  %v3495_v4 = vld [vmem:[%s4676_s1 + $0x48] sm:$0xff]   ;;  %v3499_v8 = vld [vmem:[%s4676_s1 + $0x50] sm:$0xff]   ;;  %v135_v34 = vunpack.c.l.s4 %v3786_v33  ;;  %vm2782_vm2 = vcmask 261120   ;;  %vm2845_vm3 = vcmask 130048  }
   0x2   :  { %v3492_v1 = vld [vmem:[%s4676_s1 + $0xc0] sm:$0xff]   ;;  %3184 = vmatprep.subr.bf16.mxu0 %v3491_v0  ;;  %v3496_v5 = vld [vmem:[%s4676_s1 + $0xc8] sm:$0xff]   ;;  %v3500_v9 = vld [vmem:[%s4676_s1 + $0xd0] sm:$0xff]   ;;  %v3939_v35 = vshrl.u32 %v137_v29, 7 }
   0x3   :  { %v3493_v2 = vld [vmem:[%s4676_s1] sm:$0xff]   ;;  %3206 = vmatprep.subr.bf16.mxu1 %v3492_v1  ;;  %v3497_v6 = vld [vmem:[%s4676_s1 + $0x8] sm:$0xff]   ;;  %v3501_v10 = vld [vmem:[%s4676_s1 + $0x10] sm:$0xff]   ;;  %v136_v38 = vunpack.c.0.s8 %v135_v34 }
   0x4   :  { %v3494_v3 = vld [vmem:[%s4676_s1 + $0x80] sm:$0xff]   ;;  %3185 = vmatpush3.bf16.msra.mxu0 %v3493_v2  ;;  %v3498_v7 = vld [vmem:[%s4676_s1 + $0x88] sm:$0xff]   ;;  %v3502_v11 = vld [vmem:[%s4676_s1 + $0x90] sm:$0xff]  }
   0x5   :  { %3207 = vmatpush3.bf16.msra.mxu1 %v3494_v3  ;;  %3186 = vmatprep.subr.bf16.mxu0 %v3495_v4  ;;  %v3503_v12 = vld [vmem:[%s4676_s1 + $0x58] sm:$0xff]   ;;  %v3507_v16 = vld [vmem:[%s4676_s1 + $0x60] sm:$0xff]   ;;  %v3511_v20 = vld [vmem:[%s4676_s1 + $0x68] sm:$0xff]   ;;  %v3960_v43 = vsub.s32 %v136_v38, %v3939_v35 }
   0x6   :  { %3208 = vmatprep.subr.bf16.mxu1 %v3496_v5  ;;  %v3504_v13 = vld [vmem:[%s4676_s1 + $0xd8] sm:$0xff]   ;;  %v3508_v17 = vld [vmem:[%s4676_s1 + $0xe0] sm:$0xff]   ;;  %v3512_v21 = vld [vmem:[%s4676_s1 + $0xe8] sm:$0xff]  }
   0x7   :  { %v3505_v14 = vld [vmem:[%s4676_s1 + $0x18] sm:$0xff]   ;;  %v3509_v18 = vld [vmem:[%s4676_s1 + $0x20] sm:$0xff]   ;;  %v3513_v22 = vld [vmem:[%s4676_s1 + $0x28] sm:$0xff]  }
   0x8   :  { %3187 = vmatpush3.bf16.msra.mxu0 %v3497_v6  ;;  %v3506_v15 = vld [vmem:[%s4676_s1 + $0x98] sm:$0xff]   ;;  %v3510_v19 = vld [vmem:[%s4676_s1 + $0xa0] sm:$0xff]   ;;  %v3514_v23 = vld [vmem:[%s4676_s1 + $0xa8] sm:$0xff]  }
   0x9   :  { %3209 = vmatpush3.bf16.msra.mxu1 %v3498_v7  ;;  %3188 = vmatprep.subr.bf16.mxu0 %v3499_v8  ;;  %v3515_v24 = vld [vmem:[%s4676_s1 + $0x70] sm:$0xff]   ;;  %v3519_v28 = vld [vmem:[%s4676_s1 + $0x78] sm:$0xff]   ;;  %v3535_v46 = vld [vmem:[%s4676_s1 + $0x140] sm:$0xff]  }
   0xa   :  { %3210 = vmatprep.subr.bf16.mxu1 %v3500_v9  ;;  %v3516_v25 = vld [vmem:[%s4676_s1 + $0xf0] sm:$0xff]   ;;  %v3520_v30 = vld [vmem:[%s4676_s1 + $0xf8] sm:$0xff]   ;;  %v3536_v51 = vld [vmem:[%s4676_s1 + $0x1c0] sm:$0xff]  }
   0xb   :  { %v3517_v26 = vld [vmem:[%s4676_s1 + $0x30] sm:$0xff]   ;;  %v3521_v31 = vld [vmem:[%s4676_s1 + $0x38] sm:$0xff]   ;;  %v3537_v60 = vld [vmem:[%s4676_s1 + $0x100] sm:$0xff]  }
   0xc   :  { %3189 = vmatpush3.bf16.msra.mxu0 %v3501_v10  ;;  %v3518_v27 = vld [vmem:[%s4676_s1 + $0xb0] sm:$0xff]   ;;  %v3522_v32 = vld [vmem:[%s4676_s1 + $0xb8] sm:$0xff]   ;;  %v3538_v1 = vld [vmem:[%s4676_s1 + $0x180] sm:$0xff]  }
   0xd   :  { %3211 = vmatpush3.bf16.msra.mxu1 %v3502_v11  ;;  %3190 = vmatprep.subr.bf16.mxu0 %v3503_v12  ;;  %v3523_v36 = vld [vmem:[%s4675_s0] ss:$48 sps:$4 sm:$0xff]   ;;  %v3531_v41 = vld [vmem:[%s4675_s0 + $0x4] ss:$48 sps:$4 sm:$0xff]   ;;  %v3539_v4 = vld [vmem:[%s4676_s1 + $0x148] sm:$0xff]  }
   0xe   :  { %3212 = vmatprep.subr.bf16.mxu1 %v3504_v13  ;;  %v3525_v37 = vld [vmem:[%s4675_s0 + $0x60] ss:$48 sps:$4 sm:$0xff]   ;;  %v3532_v42 = vld [vmem:[%s4675_s0 + $0x64] ss:$48 sps:$4 sm:$0xff]   ;;  %v140_v47 = vrot.slane %v3523_v36, %v3960_v43  ;;  %v147_v52 = vrot.slane %v3531_v41, %v3960_v43  ;;  %v3540_v7 = vld [vmem:[%s4676_s1 + $0x1c8] sm:$0xff]  }
   0xf   :  { %v3527_v39 = vld [vmem:[%s4675_s0 + $0xc0] ss:$48 sps:$4 sm:$0xff]   ;;  %v3533_v44 = vld [vmem:[%s4675_s0 + $0xc4] ss:$48 sps:$4 sm:$0xff]   ;;  %v154_v48 = vrot.slane %v3525_v37, %v3960_v43  ;;  %v161_v53 = vrot.slane %v3532_v42, %v3960_v43  ;;  %v3541_v8 = vld [vmem:[%s4676_s1 + $0x108] sm:$0xff]  }
  0x10   :  { %3191 = vmatpush3.bf16.msra.mxu0 %v3505_v14  ;;  %v3529_v40 = vld [vmem:[%s4675_s0 + $0x120] ss:$48 sps:$4 sm:$0xff]   ;;  %v3534_v45 = vld [vmem:[%s4675_s0 + $0x124] ss:$48 sps:$4 sm:$0xff]   ;;  %v356_v49 = vrot.slane %v3527_v39, %v3960_v43  ;;  %v363_v54 = vrot.slane %v3533_v44, %v3960_v43  ;;  %v3542_v9 = vld [vmem:[%s4676_s1 + $0x188] sm:$0xff]  }
  0x11   :  { %3213 = vmatpush3.bf16.msra.mxu1 %v3506_v15  ;;  %3192 = vmatprep.subr.bf16.mxu0 %v3507_v16  ;;  %v370_v50 = vrot.slane %v3529_v40, %v3960_v43  ;;  %v377_v55 = vrot.slane %v3534_v45, %v3960_v43  ;;  %v163_v56 = vcombine.high %v140_v47, %v154_v48  ;;  %v3543_v10 = vld [vmem:[%s4676_s1 + $0x150] sm:$0xff]   ;;  %v3547_v14 = vld [vmem:[%s4676_s1 + $0x158] sm:$0xff]  }
  0x12   :  { %3214 = vmatprep.subr.bf16.mxu1 %v3508_v17  ;;  %v162_v58 = vcombine.low %v140_v47, %v154_v48  ;;  %v165_v61 = vcombine.high %v147_v52, %v161_v53  ;;  %v164_v63 = vcombine.low %v147_v52, %v161_v53  ;;  %v3544_v11 = vld [vmem:[%s4676_s1 + $0x1d0] sm:$0xff]   ;;  %v3548_v15 = vld [vmem:[%s4676_s1 + $0x1d8] sm:$0xff]  }
  0x13   :  { %v379_v57 = vcombine.high %v356_v49, %v370_v50  ;;  %v378_v59 = vcombine.low %v356_v49, %v370_v50  ;;  %v381_v62 = vcombine.high %v363_v54, %v377_v55  ;;  %v380_v0 = vcombine.low %v363_v54, %v377_v55  ;;  %v3545_v12 = vld [vmem:[%s4676_s1 + $0x110] sm:$0xff]   ;;  %v3549_v16 = vld [vmem:[%s4676_s1 + $0x118] sm:$0xff]   ;;  %v3579_v49 = vld [vmem:[%s4676_s1 + $0x240] sm:$0xff]  }
  0x14   :  { %3193 = vmatpush3.bf16.msra.mxu0 %v3509_v18  ;;  %v3546_v13 = vld [vmem:[%s4676_s1 + $0x190] sm:$0xff]   ;;  %v3550_v17 = vld [vmem:[%s4676_s1 + $0x198] sm:$0xff]   ;;  %v3551_v18 = vld [vmem:[%s4676_s1 + $0x160] sm:$0xff]  }
  0x15   :  { %3215 = vmatpush3.bf16.msra.mxu1 %v3510_v19  ;;  %3194 = vmatprep.subr.bf16.mxu0 %v3511_v20  ;;  %v611_v2 = vpack.c.bf16 %v379_v57, %v163_v56  ;;  %v610_v3 = vpack.c.bf16 %v378_v59, %v162_v58  ;;  %v613_v5 = vpack.c.bf16 %v381_v62, %v165_v61  ;;  %v3552_v19 = vld [vmem:[%s4676_s1 + $0x1e0] sm:$0xff]   ;;  %v3562_v29 = vld [vmem:[%s4676_s1 + $0x1b0] sm:$0xff]   ;;  %v3566_v33 = vld [vmem:[%s4676_s1 + $0x1b8] sm:$0xff]  }
  0x16   :  { %3216 = vmatprep.subr.bf16.mxu1 %v3512_v21  ;;  %v612_v6 = vpack.c.bf16 %v380_v0, %v164_v63  ;;  %v3553_v20 = vld [vmem:[%s4676_s1 + $0x120] sm:$0xff]   ;;  %v3567_v34 = vld [vmem:[%s4675_s0 + $0x8] ss:$48 sps:$4 sm:$0xff]   ;;  %v3575_v39 = vld [vmem:[%s4675_s0 + $0xc] ss:$48 sps:$4 sm:$0xff]  }
  0x17   :  { %2209 = vmatprep.mubr.bf16.mxu0 %v611_v2  ;;  %2250 = vmatprep.mubr.bf16.mxu1 %v613_v5  ;;  %v3554_v21 = vld [vmem:[%s4676_s1 + $0x1a0] sm:$0xff]   ;;  %v3569_v36 = vld [vmem:[%s4675_s0 + $0x68] ss:$48 sps:$4 sm:$0xff]   ;;  %v176_v40 = vrot.slane %v3567_v34, %v3960_v43  ;;  %v3576_v42 = vld [vmem:[%s4675_s0 + $0x6c] ss:$48 sps:$4 sm:$0xff]   ;;  %v183_v48 = vrot.slane %v3575_v39, %v3960_v43 }
  0x18   :  { %3195 = vmatpush3.bf16.msra.mxu0 %v3513_v22  ;;  %v3555_v22 = vld [vmem:[%s4676_s1 + $0x168] sm:$0xff]   ;;  %v190_v41 = vrot.slane %v3569_v36, %v3960_v43  ;;  %v3580_v54 = vld [vmem:[%s4676_s1 + $0x2c0] sm:$0xff]  }
  0x19   :  { %3217 = vmatpush3.bf16.msra.mxu1 %v3514_v23  ;;  %3196 = vmatprep.subr.bf16.mxu0 %v3515_v24  ;;  %v3556_v23 = vld [vmem:[%s4676_s1 + $0x1e8] sm:$0xff]   ;;  %v3581_v58 = vld [vmem:[%s4676_s1 + $0x200] sm:$0xff]  }
  0x1a   :  { %3218 = vmatprep.subr.bf16.mxu1 %v3516_v25  ;;  %v3557_v24 = vld [vmem:[%s4676_s1 + $0x128] sm:$0xff]   ;;  %v199_v50 = vcombine.high %v176_v40, %v190_v41  ;;  %v198_v56 = vcombine.low %v176_v40, %v190_v41  ;;  %v3582_v63 = vld [vmem:[%s4676_s1 + $0x280] sm:$0xff]  }
  0x1b   :  { %v3558_v25 = vld [vmem:[%s4676_s1 + $0x1a8] sm:$0xff]   ;;  %v3615_v34 = vld [vmem:[%s4675_s0 + $0xd0] ss:$48 sps:$4 sm:$0xff]   ;;  %v3620_v39 = vld [vmem:[%s4675_s0 + $0x74] ss:$48 sps:$4 sm:$0xff]  }
  0x1c   :  { %3197 = vmatpush3.bf16.msra.mxu0 %v3517_v26  ;;  %v3559_v26 = vld [vmem:[%s4676_s1 + $0x170] sm:$0xff]   ;;  %v3571_v37 = vld [vmem:[%s4675_s0 + $0xc8] ss:$48 sps:$4 sm:$0xff]   ;;  %v3577_v44 = vld [vmem:[%s4675_s0 + $0xcc] ss:$48 sps:$4 sm:$0xff]  }
  0x1d   :  { %3219 = vmatpush3.bf16.msra.mxu1 %v3518_v27  ;;  %3198 = vmatprep.subr.bf16.mxu0 %v3519_v28  ;;  %v3560_v27 = vld [vmem:[%s4676_s1 + $0x1f0] sm:$0xff]   ;;  %v3573_v38 = vld [vmem:[%s4675_s0 + $0x128] ss:$48 sps:$4 sm:$0xff]   ;;  %v3578_v45 = vld [vmem:[%s4675_s0 + $0x12c] ss:$48 sps:$4 sm:$0xff]   ;;  %v399_v52 = vrot.slane %v3577_v44, %v3960_v43 }
  0x1e   :  { %3220 = vmatprep.subr.bf16.mxu1 %v3520_v30  ;;  %v3561_v28 = vld [vmem:[%s4676_s1 + $0x130] sm:$0xff]   ;;  %v3563_v30 = vld [vmem:[%s4676_s1 + $0x178] sm:$0xff]   ;;  %v406_v47 = vrot.slane %v3573_v38, %v3960_v43  ;;  %v413_v53 = vrot.slane %v3578_v45, %v3960_v43  ;;  %v3583_v2 = vld [vmem:[%s4676_s1 + $0x248] sm:$0xff]  }
  0x1f   :  { %v3584_v5 = vld [vmem:[%s4676_s1 + $0x2c8] sm:$0xff]   ;;  %v3617_v36 = vld [vmem:[%s4675_s0 + $0x130] ss:$48 sps:$4 sm:$0xff]   ;;  %v3619_v38 = vld [vmem:[%s4675_s0 + $0x14] ss:$48 sps:$4 sm:$0xff]  }
  0x20   :  { %3199 = vmatpush3.bf16.msra.mxu0 %v3521_v31  ;;  %v3564_v31 = vld [vmem:[%s4676_s1 + $0x1f8] sm:$0xff]   ;;  %v416_v62 = vcombine.low %v399_v52, %v413_v53  ;;  %v3621_v40 = vld [vmem:[%s4675_s0 + $0xd4] ss:$48 sps:$4 sm:$0xff]   ;;  %v442_v44 = vrot.slane %v3617_v36, %v3960_v43 }
  0x21   :  { %3221 = vmatpush3.bf16.msra.mxu1 %v3522_v32  ;;  %3228 = vmatprep.subr.bf16.mxu0 %v3535_v46  ;;  %v3565_v32 = vld [vmem:[%s4676_s1 + $0x138] sm:$0xff]   ;;  %v392_v46 = vrot.slane %v3571_v37, %v3960_v43  ;;  %v3622_v45 = vld [vmem:[%s4675_s0 + $0x134] ss:$48 sps:$4 sm:$0xff]  }
  0x22   :  { %3250 = vmatprep.subr.bf16.mxu1 %v3536_v51  ;;  %v197_v51 = vrot.slane %v3576_v42, %v3960_v43  ;;  %v428_v42 = vrot.slane %v3615_v34, %v3960_v43  ;;  %v3663_v34 = vld [vmem:[%s4675_s0 + $0x1c] ss:$48 sps:$4 sm:$0xff]  }
  0x23   :  { %2210 = vmatmul.mubr.bf16.vlgmr.msra.gmra.mrb[0].mxu0 %v610_v3  ;;  %v415_v55 = vcombine.high %v392_v46, %v406_v47  ;;  %v414_v57 = vcombine.low %v392_v46, %v406_v47  ;;  %v219_v46 = vrot.slane %v3619_v38, %v3960_v43  ;;  %v233_v47 = vrot.slane %v3620_v39, %v3960_v43  ;;  %v3664_v36 = vld [vmem:[%s4675_s0 + $0x7c] ss:$48 sps:$4 sm:$0xff]  }
  0x24   :  { %2251 = vmatmul.mubr.bf16.vlgmr.msra.gmra.mrb[0].mxu1 %v612_v6  ;;  %3229 = vmatpush3.bf16.msra.mxu0 %v3537_v60  ;;  %v201_v59 = vcombine.high %v183_v48, %v197_v51  ;;  %v417_v60 = vcombine.high %v399_v52, %v413_v53  ;;  %v200_v61 = vcombine.low %v183_v48, %v197_v51  ;;  %v3585_v6 = vld [vmem:[%s4676_s1 + $0x208] sm:$0xff]  }
  0x25   :  { %3251 = vmatpush3.bf16.msra.mxu1 %v3538_v1  ;;  %3230 = vmatprep.subr.bf16.mxu0 %v3539_v4  ;;  %v615_v0 = vpack.c.bf16 %v415_v55, %v199_v50  ;;  %v614_v1 = vpack.c.bf16 %v414_v57, %v198_v56  ;;  %v435_v48 = vrot.slane %v3621_v40, %v3960_v43  ;;  %v3665_v40 = vld [vmem:[%s4675_s0 + $0xdc] ss:$48 sps:$4 sm:$0xff]  }
  0x26   :  { %3252 = vmatprep.subr.bf16.mxu1 %v3540_v7  ;;  %v617_v3 = vpack.c.bf16 %v417_v60, %v201_v59  ;;  %v616_v4 = vpack.c.bf16 %v416_v62, %v200_v61  ;;  %v3586_v7 = vld [vmem:[%s4676_s1 + $0x288] sm:$0xff]   ;;  %v451_v51 = vcombine.high %v428_v42, %v442_v44  ;;  %v449_v52 = vrot.slane %v3622_v45, %v3960_v43  ;;  %v3626_v62 = vld [vmem:[%s4676_s1 + $0x380] sm:$0xff]  }
  0x27   :  { %2291 = vmatprep.mubr.bf16.mxu0 %v615_v0  ;;  %v237_v55 = vcombine.high %v219_v46, %v233_v47  ;;  %v450_v56 = vcombine.low %v428_v42, %v442_v44  ;;  %v236_v57 = vcombine.low %v219_v46, %v233_v47  ;;  %v3627_v0 = vld [vmem:[%s4676_s1 + $0x348] sm:$0xff]   ;;  %v255_v44 = vrot.slane %v3663_v34, %v3960_v43  ;;  %v3667_v46 = vld [vmem:[%s4676_s1 + $0x440] sm:$0xff]  }
  0x28   :  { %3231 = vmatpush3.bf16.msra.mxu0 %v3541_v8  ;;  %2332 = vmatprep.mubr.bf16.mxu1 %v617_v3  ;;  %v3587_v8 = vld [vmem:[%s4676_s1 + $0x250] sm:$0xff]   ;;  %v453_v60 = vcombine.high %v435_v48, %v449_v52  ;;  %v452_v61 = vcombine.low %v435_v48, %v449_v52  ;;  %v3628_v3 = vld [vmem:[%s4676_s1 + $0x3c8] sm:$0xff]   ;;  %v269_v45 = vrot.slane %v3664_v36, %v3960_v43 }
  0x29   :  { %3253 = vmatpush3.bf16.msra.mxu1 %v3542_v9  ;;  %3232 = vmatprep.subr.bf16.mxu0 %v3543_v10  ;;  %v3588_v9 = vld [vmem:[%s4676_s1 + $0x2d0] sm:$0xff]   ;;  %v471_v48 = vrot.slane %v3665_v40, %v3960_v43 }
  0x2a   :  { %3254 = vmatprep.subr.bf16.mxu1 %v3544_v11  ;;  %v3589_v10 = vld [vmem:[%s4676_s1 + $0x210] sm:$0xff]  }
  0x2b   :  { %v3590_v11 = vld [vmem:[%s4676_s1 + $0x290] sm:$0xff]  }
  0x2c   :  { %3233 = vmatpush3.bf16.msra.mxu0 %v3545_v12  ;;  %v3591_v12 = vld [vmem:[%s4676_s1 + $0x258] sm:$0xff]   ;;  %v3708_v36 = vld [vmem:[%s4675_s0 + $0x84] ss:$48 sps:$4 sm:$0xff]  }
  0x2d   :  { %3255 = vmatpush3.bf16.msra.mxu1 %v3546_v13  ;;  %3234 = vmatprep.subr.bf16.mxu0 %v3547_v14  ;;  %v3592_v13 = vld [vmem:[%s4676_s1 + $0x2d8] sm:$0xff]  }
  0x2e   :  { %3256 = vmatprep.subr.bf16.mxu1 %v3548_v15  ;;  %v3593_v14 = vld [vmem:[%s4676_s1 + $0x218] sm:$0xff]  }
  0x2f   :  { %v3594_v15 = vld [vmem:[%s4676_s1 + $0x298] sm:$0xff]  }
  0x30   :  { %3235 = vmatpush3.bf16.msra.mxu0 %v3549_v16  ;;  %v3595_v16 = vld [vmem:[%s4676_s1 + $0x260] sm:$0xff]  }
  0x31   :  { %3257 = vmatpush3.bf16.msra.mxu1 %v3550_v17  ;;  %3236 = vmatprep.subr.bf16.mxu0 %v3551_v18  ;;  %v3596_v17 = vld [vmem:[%s4676_s1 + $0x2e0] sm:$0xff]  }
  0x32   :  { %3258 = vmatprep.subr.bf16.mxu1 %v3552_v19  ;;  %v3597_v18 = vld [vmem:[%s4676_s1 + $0x220] sm:$0xff]  }
  0x33   :  { %v3598_v19 = vld [vmem:[%s4676_s1 + $0x2a0] sm:$0xff]  }
  0x34   :  { %3237 = vmatpush3.bf16.msra.mxu0 %v3553_v20  ;;  %v3599_v20 = vld [vmem:[%s4676_s1 + $0x268] sm:$0xff]  }
  0x35   :  { %3259 = vmatpush3.bf16.msra.mxu1 %v3554_v21  ;;  %3238 = vmatprep.subr.bf16.mxu0 %v3555_v22  ;;  %v3600_v21 = vld [vmem:[%s4676_s1 + $0x2e8] sm:$0xff]  }
  0x36   :  { %3260 = vmatprep.subr.bf16.mxu1 %v3556_v23  ;;  %v3601_v22 = vld [vmem:[%s4676_s1 + $0x228] sm:$0xff]  }
  0x37   :  { %v3602_v23 = vld [vmem:[%s4676_s1 + $0x2a8] sm:$0xff]  }
  0x38   :  { %3239 = vmatpush3.bf16.msra.mxu0 %v3557_v24  ;;  %v3603_v24 = vld [vmem:[%s4676_s1 + $0x270] sm:$0xff]  }
  0x39   :  { %3261 = vmatpush3.bf16.msra.mxu1 %v3558_v25  ;;  %3240 = vmatprep.subr.bf16.mxu0 %v3559_v26  ;;  %v3604_v25 = vld [vmem:[%s4676_s1 + $0x2f0] sm:$0xff]  }
  0x3a   :  { %3262 = vmatprep.subr.bf16.mxu1 %v3560_v27  ;;  %v3605_v26 = vld [vmem:[%s4676_s1 + $0x230] sm:$0xff]  }
  0x3b   :  { %v3606_v27 = vld [vmem:[%s4676_s1 + $0x2b0] sm:$0xff]  }
  0x3c   :  { %3241 = vmatpush3.bf16.msra.mxu0 %v3561_v28  ;;  %v3607_v28 = vld [vmem:[%s4676_s1 + $0x278] sm:$0xff]  }
  0x3d   :  { %3263 = vmatpush3.bf16.msra.mxu1 %v3562_v29  ;;  %3242 = vmatprep.subr.bf16.mxu0 %v3563_v30  ;;  %v3608_v29 = vld [vmem:[%s4676_s1 + $0x2f8] sm:$0xff]  }
  0x3e   :  { %3264 = vmatprep.subr.bf16.mxu1 %v3564_v31  ;;  %v3609_v30 = vld [vmem:[%s4676_s1 + $0x238] sm:$0xff]  }
  0x3f   :  { %v3610_v31 = vld [vmem:[%s4676_s1 + $0x2b8] sm:$0xff]  }
  0x40   :  { %3243 = vmatpush3.bf16.msra.mxu0 %v3565_v32  ;;  %v3611_v32 = vld [vmem:[%s4675_s0 + $0x10] ss:$48 sps:$4 sm:$0xff]  }
  0x41   :  { %3265 = vmatpush3.bf16.msra.mxu1 %v3566_v33  ;;  %3272 = vmatprep.subr.bf16.mxu0 %v3579_v49  ;;  %v3613_v33 = vld [vmem:[%s4675_s0 + $0x70] ss:$48 sps:$4 sm:$0xff]   ;;  %v212_v37 = vrot.slane %v3611_v32, %v3960_v43  ;;  %v3659_v32 = vld [vmem:[%s4675_s0 + $0xd8] ss:$48 sps:$4 sm:$0xff]  }
  0x42   :  { %3294 = vmatprep.subr.bf16.mxu1 %v3580_v54  ;;  %v226_v41 = vrot.slane %v3613_v33, %v3960_v43  ;;  %v3623_v49 = vld [vmem:[%s4676_s1 + $0x340] sm:$0xff]   ;;  %v3661_v33 = vld [vmem:[%s4675_s0 + $0x138] ss:$48 sps:$4 sm:$0xff]   ;;  %v464_v39 = vrot.slane %v3659_v32, %v3960_v43 }
  0x43   :  { %2292 = vmatmul.mubr.bf16.vlgmr.msra.gmra.mrb[4].mxu0 %v614_v1  ;;  %v3624_v54 = vld [vmem:[%s4676_s1 + $0x3c0] sm:$0xff]   ;;  %v621_v1 = vpack.c.bf16 %v453_v60, %v237_v55  ;;  %v478_v42 = vrot.slane %v3661_v33, %v3960_v43  ;;  %v272_v55 = vcombine.low %v255_v44, %v269_v45 }
  0x44   :  { %2333 = vmatmul.mubr.bf16.vlgmr.msra.gmra.mrb[4].mxu1 %v616_v4  ;;  %3273 = vmatpush3.bf16.msra.mxu0 %v3581_v58  ;;  %v235_v50 = vcombine.high %v212_v37, %v226_v41  ;;  %v234_v53 = vcombine.low %v212_v37, %v226_v41  ;;  %v3625_v58 = vld [vmem:[%s4676_s1 + $0x300] sm:$0xff]   ;;  %v3629_v4 = vld [vmem:[%s4676_s1 + $0x308] sm:$0xff]  }
  0x45   :  { %3295 = vmatpush3.bf16.msra.mxu1 %v3582_v63  ;;  %3274 = vmatprep.subr.bf16.mxu0 %v3583_v2  ;;  %v620_v2 = vpack.c.bf16 %v452_v61, %v236_v57  ;;  %v3666_v41 = vld [vmem:[%s4675_s0 + $0x13c] ss:$48 sps:$4 sm:$0xff]   ;;  %v487_v52 = vcombine.high %v464_v39, %v478_v42  ;;  %v3707_v32 = vld [vmem:[%s4675_s0 + $0x24] ss:$48 sps:$4 sm:$0xff]  }
  0x46   :  { %3296 = vmatprep.subr.bf16.mxu1 %v3584_v5  ;;  %v619_v59 = vpack.c.bf16 %v451_v51, %v235_v50  ;;  %v618_v63 = vpack.c.bf16 %v450_v56, %v234_v53  ;;  %2414 = vmatprep.mubr.bf16.mxu1 %v621_v1  ;;  %v3630_v5 = vld [vmem:[%s4676_s1 + $0x388] sm:$0xff]   ;;  %v3668_v51 = vld [vmem:[%s4676_s1 + $0x4c0] sm:$0xff]   ;;  %v273_v53 = vcombine.high %v255_v44, %v269_v45 }
  0x47   :  { %v3669_v56 = vld [vmem:[%s4676_s1 + $0x400] sm:$0xff]   ;;  %v3672_v1 = vld [vmem:[%s4676_s1 + $0x4c8] sm:$0xff]   ;;  %v305_v45 = vrot.slane %v3708_v36, %v3960_v43 }
  0x48   :  { %3275 = vmatpush3.bf16.msra.mxu0 %v3585_v6  ;;  %2373 = vmatprep.mubr.bf16.mxu0 %v619_v59  ;;  %v3631_v6 = vld [vmem:[%s4676_s1 + $0x350] sm:$0xff]   ;;  %v3670_v59 = vld [vmem:[%s4676_s1 + $0x480] sm:$0xff]  }
  0x49   :  { %3297 = vmatpush3.bf16.msra.mxu1 %v3586_v7  ;;  %3276 = vmatprep.subr.bf16.mxu0 %v3587_v8  ;;  %v3632_v7 = vld [vmem:[%s4676_s1 + $0x3d0] sm:$0xff]  }
  0x4a   :  { %3298 = vmatprep.subr.bf16.mxu1 %v3588_v9  ;;  %v3633_v8 = vld [vmem:[%s4676_s1 + $0x310] sm:$0xff]  }
  0x4b   :  { %v3634_v9 = vld [vmem:[%s4676_s1 + $0x390] sm:$0xff]  }
  0x4c   :  { %3277 = vmatpush3.bf16.msra.mxu0 %v3589_v10  ;;  %v3635_v10 = vld [vmem:[%s4676_s1 + $0x358] sm:$0xff]  }
  0x4d   :  { %3299 = vmatpush3.bf16.msra.mxu1 %v3590_v11  ;;  %3278 = vmatprep.subr.bf16.mxu0 %v3591_v12  ;;  %v3636_v11 = vld [vmem:[%s4676_s1 + $0x3d8] sm:$0xff]  }
  0x4e   :  { %3300 = vmatprep.subr.bf16.mxu1 %v3592_v13  ;;  %v3637_v12 = vld [vmem:[%s4676_s1 + $0x318] sm:$0xff]  }
  0x4f   :  { %v3638_v13 = vld [vmem:[%s4676_s1 + $0x398] sm:$0xff]  }
  0x50   :  { %3279 = vmatpush3.bf16.msra.mxu0 %v3593_v14  ;;  %v3639_v14 = vld [vmem:[%s4676_s1 + $0x360] sm:$0xff]  }
  0x51   :  { %3301 = vmatpush3.bf16.msra.mxu1 %v3594_v15  ;;  %3280 = vmatprep.subr.bf16.mxu0 %v3595_v16  ;;  %v3640_v15 = vld [vmem:[%s4676_s1 + $0x3e0] sm:$0xff]  }
  0x52   :  { %3302 = vmatprep.subr.bf16.mxu1 %v3596_v17  ;;  %v3641_v16 = vld [vmem:[%s4676_s1 + $0x320] sm:$0xff]  }
  0x53   :  { %v3642_v17 = vld [vmem:[%s4676_s1 + $0x3a0] sm:$0xff]  }
  0x54   :  { %3281 = vmatpush3.bf16.msra.mxu0 %v3597_v18  ;;  %v3643_v18 = vld [vmem:[%s4676_s1 + $0x368] sm:$0xff]  }
  0x55   :  { %3303 = vmatpush3.bf16.msra.mxu1 %v3598_v19  ;;  %3282 = vmatprep.subr.bf16.mxu0 %v3599_v20  ;;  %v3644_v19 = vld [vmem:[%s4676_s1 + $0x3e8] sm:$0xff]  }
  0x56   :  { %3304 = vmatprep.subr.bf16.mxu1 %v3600_v21  ;;  %v3645_v20 = vld [vmem:[%s4676_s1 + $0x328] sm:$0xff]  }
  0x57   :  { %v3646_v21 = vld [vmem:[%s4676_s1 + $0x3a8] sm:$0xff]  }
  0x58   :  { %3283 = vmatpush3.bf16.msra.mxu0 %v3601_v22  ;;  %v3647_v22 = vld [vmem:[%s4676_s1 + $0x370] sm:$0xff]  }
  0x59   :  { %3305 = vmatpush3.bf16.msra.mxu1 %v3602_v23  ;;  %3284 = vmatprep.subr.bf16.mxu0 %v3603_v24  ;;  %v3648_v23 = vld [vmem:[%s4676_s1 + $0x3f0] sm:$0xff]  }
  0x5a   :  { %3306 = vmatprep.subr.bf16.mxu1 %v3604_v25  ;;  %v3649_v24 = vld [vmem:[%s4676_s1 + $0x330] sm:$0xff]  }
  0x5b   :  { %v3650_v25 = vld [vmem:[%s4676_s1 + $0x3b0] sm:$0xff]  }
  0x5c   :  { %3285 = vmatpush3.bf16.msra.mxu0 %v3605_v26  ;;  %v3651_v26 = vld [vmem:[%s4676_s1 + $0x378] sm:$0xff]  }
  0x5d   :  { %3307 = vmatpush3.bf16.msra.mxu1 %v3606_v27  ;;  %3286 = vmatprep.subr.bf16.mxu0 %v3607_v28  ;;  %v3652_v27 = vld [vmem:[%s4676_s1 + $0x3f8] sm:$0xff]  }
  0x5e   :  { %3308 = vmatprep.subr.bf16.mxu1 %v3608_v29  ;;  %v3653_v28 = vld [vmem:[%s4676_s1 + $0x338] sm:$0xff]  }
  0x5f   :  { %v3654_v29 = vld [vmem:[%s4676_s1 + $0x3b8] sm:$0xff]  }
  0x60   :  { %3287 = vmatpush3.bf16.msra.mxu0 %v3609_v30  ;;  %v3655_v30 = vld [vmem:[%s4675_s0 + $0x18] ss:$48 sps:$4 sm:$0xff]  }
  0x61   :  { %3309 = vmatpush3.bf16.msra.mxu1 %v3610_v31  ;;  %3316 = vmatprep.subr.bf16.mxu0 %v3623_v49  ;;  %v3657_v31 = vld [vmem:[%s4675_s0 + $0x78] ss:$48 sps:$4 sm:$0xff]   ;;  %v248_v37 = vrot.slane %v3655_v30, %v3960_v43  ;;  %v485_v49 = vrot.slane %v3666_v41, %v3960_v43  ;;  %v3703_v30 = vld [vmem:[%s4675_s0 + $0xe0] ss:$48 sps:$4 sm:$0xff]   ;;  %v291_v41 = vrot.slane %v3707_v32, %v3960_v43  ;;  %v3752_v32 = vld [vmem:[%s4675_s0 + $0x8c] ss:$48 sps:$4 sm:$0xff]  }
  0x62   :  { %3338 = vmatprep.subr.bf16.mxu1 %v3624_v54  ;;  %v262_v38 = vrot.slane %v3657_v31, %v3960_v43  ;;  %v486_v54 = vcombine.low %v464_v39, %v478_v42  ;;  %v3705_v31 = vld [vmem:[%s4675_s0 + $0x140] ss:$48 sps:$4 sm:$0xff]   ;;  %v500_v39 = vrot.slane %v3703_v30, %v3960_v43 }
  0x63   :  { %2374 = vmatmul.mubr.bf16.vlgmr.msra.gmra.mrb[8].mxu0 %v618_v63  ;;  %v489_v57 = vcombine.high %v471_v48, %v485_v49  ;;  %v514_v40 = vrot.slane %v3705_v31, %v3960_v43  ;;  %v3711_v42 = vld [vmem:[%s4676_s1 + $0x540] sm:$0xff]   ;;  %v3751_v31 = vld [vmem:[%s4675_s0 + $0x2c] ss:$48 sps:$4 sm:$0xff]  }
  0x64   :  { %3317 = vmatpush3.bf16.msra.mxu0 %v3625_v58  ;;  %2415 = vmatmul.mubr.bf16.vlgmr.msra.gmra.mrb[8].mxu1 %v620_v2  ;;  %v271_v47 = vcombine.high %v248_v37, %v262_v38  ;;  %v270_v50 = vcombine.low %v248_v37, %v262_v38  ;;  %v488_v58 = vcombine.low %v471_v48, %v485_v49  ;;  %v3673_v2 = vld [vmem:[%s4676_s1 + $0x408] sm:$0xff]   ;;  %v3709_v37 = vld [vmem:[%s4675_s0 + $0xe4] ss:$48 sps:$4 sm:$0xff]  }
  0x65   :  { %3318 = vmatprep.subr.bf16.mxu0 %v3627_v0  ;;  %3339 = vmatpush3.bf16.msra.mxu1 %v3626_v62  ;;  %v3671_v62 = vld [vmem:[%s4676_s1 + $0x448] sm:$0xff]   ;;  %v625_v63 = vpack.c.bf16 %v489_v57, %v273_v53  ;;  %v3710_v38 = vld [vmem:[%s4675_s0 + $0x144] ss:$48 sps:$4 sm:$0xff]   ;;  %v523_v49 = vcombine.high %v500_v39, %v514_v40  ;;  %v309_v53 = vcombine.high %v291_v41, %v305_v45 }
  0x66   :  { %3340 = vmatprep.subr.bf16.mxu1 %v3628_v3  ;;  %v623_v60 = vpack.c.bf16 %v487_v52, %v271_v47  ;;  %v622_v61 = vpack.c.bf16 %v486_v54, %v270_v50  ;;  %v624_v0 = vpack.c.bf16 %v488_v58, %v272_v55  ;;  %v3674_v3 = vld [vmem:[%s4676_s1 + $0x488] sm:$0xff]   ;;  %v521_v47 = vrot.slane %v3710_v38, %v3960_v43  ;;  %v3712_v48 = vld [vmem:[%s4676_s1 + $0x5c0] sm:$0xff]  }
  0x67   :  { %2496 = vmatprep.mubr.bf16.mxu1 %v625_v63  ;;  %v3713_v52 = vld [vmem:[%s4676_s1 + $0x500] sm:$0xff]   ;;  %v308_v55 = vcombine.low %v291_v41, %v305_v45  ;;  %v3716_v63 = vld [vmem:[%s4676_s1 + $0x5c8] sm:$0xff]  }
  0x68   :  { %3319 = vmatpush3.bf16.msra.mxu0 %v3629_v4  ;;  %2455 = vmatprep.mubr.bf16.mxu0 %v623_v60  ;;  %v3675_v4 = vld [vmem:[%s4676_s1 + $0x450] sm:$0xff]   ;;  %v3714_v57 = vld [vmem:[%s4676_s1 + $0x580] sm:$0xff]   ;;  %v3715_v60 = vld [vmem:[%s4676_s1 + $0x548] sm:$0xff]  }
  0x69   :  { %3320 = vmatprep.subr.bf16.mxu0 %v3631_v6  ;;  %3341 = vmatpush3.bf16.msra.mxu1 %v3630_v5  ;;  %v3676_v5 = vld [vmem:[%s4676_s1 + $0x4d0] sm:$0xff]   ;;  %v3754_v38 = vld [vmem:[%s4675_s0 + $0x14c] ss:$48 sps:$4 sm:$0xff]  }
  0x6a   :  { %3342 = vmatprep.subr.bf16.mxu1 %v3632_v7  ;;  %v3677_v6 = vld [vmem:[%s4676_s1 + $0x410] sm:$0xff]   ;;  %v557_v45 = vrot.slane %v3754_v38, %v3960_v43 }
  0x6b   :  { %v3678_v7 = vld [vmem:[%s4676_s1 + $0x490] sm:$0xff]  }
  0x6c   :  { %3321 = vmatpush3.bf16.msra.mxu0 %v3633_v8  ;;  %v3679_v8 = vld [vmem:[%s4676_s1 + $0x458] sm:$0xff]  }
  0x6d   :  { %3322 = vmatprep.subr.bf16.mxu0 %v3635_v10  ;;  %3343 = vmatpush3.bf16.msra.mxu1 %v3634_v9  ;;  %v3680_v9 = vld [vmem:[%s4676_s1 + $0x4d8] sm:$0xff]  }
  0x6e   :  { %3344 = vmatprep.subr.bf16.mxu1 %v3636_v11  ;;  %v3681_v10 = vld [vmem:[%s4676_s1 + $0x418] sm:$0xff]  }
  0x6f   :  { %v3682_v11 = vld [vmem:[%s4676_s1 + $0x498] sm:$0xff]  }
  0x70   :  { %3323 = vmatpush3.bf16.msra.mxu0 %v3637_v12  ;;  %v3683_v12 = vld [vmem:[%s4676_s1 + $0x460] sm:$0xff]  }
  0x71   :  { %3324 = vmatprep.subr.bf16.mxu0 %v3639_v14  ;;  %3345 = vmatpush3.bf16.msra.mxu1 %v3638_v13  ;;  %v3684_v13 = vld [vmem:[%s4676_s1 + $0x4e0] sm:$0xff]  }
  0x72   :  { %3346 = vmatprep.subr.bf16.mxu1 %v3640_v15  ;;  %v3685_v14 = vld [vmem:[%s4676_s1 + $0x420] sm:$0xff]  }
  0x73   :  { %v3686_v15 = vld [vmem:[%s4676_s1 + $0x4a0] sm:$0xff]  }
  0x74   :  { %3325 = vmatpush3.bf16.msra.mxu0 %v3641_v16  ;;  %v3687_v16 = vld [vmem:[%s4676_s1 + $0x468] sm:$0xff]  }
  0x75   :  { %3326 = vmatprep.subr.bf16.mxu0 %v3643_v18  ;;  %3347 = vmatpush3.bf16.msra.mxu1 %v3642_v17  ;;  %v3688_v17 = vld [vmem:[%s4676_s1 + $0x4e8] sm:$0xff]  }
  0x76   :  { %3348 = vmatprep.subr.bf16.mxu1 %v3644_v19  ;;  %v3689_v18 = vld [vmem:[%s4676_s1 + $0x428] sm:$0xff]  }
  0x77   :  { %v3690_v19 = vld [vmem:[%s4676_s1 + $0x4a8] sm:$0xff]  }
  0x78   :  { %3327 = vmatpush3.bf16.msra.mxu0 %v3645_v20  ;;  %v3691_v20 = vld [vmem:[%s4676_s1 + $0x470] sm:$0xff]  }
  0x79   :  { %3328 = vmatprep.subr.bf16.mxu0 %v3647_v22  ;;  %3349 = vmatpush3.bf16.msra.mxu1 %v3646_v21  ;;  %v3692_v21 = vld [vmem:[%s4676_s1 + $0x4f0] sm:$0xff]  }
  0x7a   :  { %3350 = vmatprep.subr.bf16.mxu1 %v3648_v23  ;;  %v3693_v22 = vld [vmem:[%s4676_s1 + $0x430] sm:$0xff]  }
  0x7b   :  { %v3694_v23 = vld [vmem:[%s4676_s1 + $0x4b0] sm:$0xff]  }
  0x7c   :  { %3329 = vmatpush3.bf16.msra.mxu0 %v3649_v24  ;;  %v3695_v24 = vld [vmem:[%s4676_s1 + $0x478] sm:$0xff]  }
  0x7d   :  { %3330 = vmatprep.subr.bf16.mxu0 %v3651_v26  ;;  %3351 = vmatpush3.bf16.msra.mxu1 %v3650_v25  ;;  %v3696_v25 = vld [vmem:[%s4676_s1 + $0x4f8] sm:$0xff]  }
  0x7e   :  { %3352 = vmatprep.subr.bf16.mxu1 %v3652_v27  ;;  %v3697_v26 = vld [vmem:[%s4676_s1 + $0x438] sm:$0xff]  }
  0x7f   :  { %v3698_v27 = vld [vmem:[%s4676_s1 + $0x4b8] sm:$0xff]  }
  0x80   :  { %3331 = vmatpush3.bf16.msra.mxu0 %v3653_v28  ;;  %v3699_v28 = vld [vmem:[%s4675_s0 + $0x20] ss:$48 sps:$4 sm:$0xff]  }
  0x81   :  { %3353 = vmatpush3.bf16.msra.mxu1 %v3654_v29  ;;  %3360 = vmatprep.subr.bf16.mxu0 %v3667_v46  ;;  %v3701_v29 = vld [vmem:[%s4675_s0 + $0x80] ss:$48 sps:$4 sm:$0xff]   ;;  %v284_v33 = vrot.slane %v3699_v28, %v3960_v43  ;;  %v507_v46 = vrot.slane %v3709_v37, %v3960_v43  ;;  %v3747_v28 = vld [vmem:[%s4675_s0 + $0xe8] ss:$48 sps:$4 sm:$0xff]  }
  0x82   :  { %3382 = vmatprep.subr.bf16.mxu1 %v3668_v51  ;;  %v298_v34 = vrot.slane %v3701_v29, %v3960_v43  ;;  %v522_v51 = vcombine.low %v500_v39, %v514_v40  ;;  %v3749_v29 = vld [vmem:[%s4675_s0 + $0x148] ss:$48 sps:$4 sm:$0xff]   ;;  %v536_v36 = vrot.slane %v3747_v28, %v3960_v43  ;;  %v327_v39 = vrot.slane %v3751_v31, %v3960_v43 }
  0x83   :  { %2456 = vmatmul.mubr.bf16.vlgmr.msra.gmra.mrb[12].mxu0 %v622_v61  ;;  %v525_v54 = vcombine.high %v507_v46, %v521_v47  ;;  %v550_v37 = vrot.slane %v3749_v29, %v3960_v43  ;;  %v341_v40 = vrot.slane %v3752_v32, %v3960_v43  ;;  %v3758_v28 = vld [vmem:[%s4678_s3 + $0x18] sm:$0xff]  }
  0x84   :  { %2497 = vmatmul.mubr.bf16.vlgmr.msra.gmra.mrb[12].mxu1 %v624_v0  ;;  %3361 = vmatpush3.bf16.msra.mxu0 %v3669_v56  ;;  %v307_v44 = vcombine.high %v284_v33, %v298_v34  ;;  %v306_v50 = vcombine.low %v284_v33, %v298_v34  ;;  %v524_v56 = vcombine.low %v507_v46, %v521_v47  ;;  %v3717_v0 = vld [vmem:[%s4676_s1 + $0x508] sm:$0xff]  }
  0x85   :  { %3383 = vmatpush3.bf16.msra.mxu1 %v3670_v59  ;;  %3362 = vmatprep.subr.bf16.mxu0 %v3671_v62  ;;  %v629_v61 = vpack.c.bf16 %v525_v54, %v309_v53  ;;  %v3753_v33 = vld [vmem:[%s4675_s0 + $0xec] ss:$48 sps:$4 sm:$0xff]   ;;  %v345_v47 = vcombine.high %v327_v39, %v341_v40 }
  0x86   :  { %3384 = vmatprep.subr.bf16.mxu1 %v3672_v1  ;;  %v627_v58 = vpack.c.bf16 %v523_v49, %v307_v44  ;;  %v626_v59 = vpack.c.bf16 %v522_v51, %v306_v50  ;;  %v628_v62 = vpack.c.bf16 %v524_v56, %v308_v55  ;;  %v3718_v1 = vld [vmem:[%s4676_s1 + $0x588] sm:$0xff]   ;;  %v543_v41 = vrot.slane %v3753_v33, %v3960_v43 }
  0x87   :  { %2578 = vmatprep.mubr.bf16.mxu1 %v629_v61  ;;  %v559_v44 = vcombine.high %v536_v36, %v550_v37  ;;  %v344_v49 = vcombine.low %v327_v39, %v341_v40 }
  0x88   :  { %3363 = vmatpush3.bf16.msra.mxu0 %v3673_v2  ;;  %2537 = vmatprep.mubr.bf16.mxu0 %v627_v58  ;;  %v3719_v2 = vld [vmem:[%s4676_s1 + $0x550] sm:$0xff]   ;;  %v561_v51 = vcombine.high %v543_v41, %v557_v45 }
  0x89   :  { %3385 = vmatpush3.bf16.msra.mxu1 %v3674_v3  ;;  %3364 = vmatprep.subr.bf16.mxu0 %v3675_v4  ;;  %v3720_v3 = vld [vmem:[%s4676_s1 + $0x5d0] sm:$0xff]  }
  0x8a   :  { %3386 = vmatprep.subr.bf16.mxu1 %v3676_v5  ;;  %v3721_v4 = vld [vmem:[%s4676_s1 + $0x510] sm:$0xff]   ;;  %v633_v54 = vpack.c.bf16 %v561_v51, %v345_v47 }
  0x8b   :  { %v3722_v5 = vld [vmem:[%s4676_s1 + $0x590] sm:$0xff]  }
  0x8c   :  { %3365 = vmatpush3.bf16.msra.mxu0 %v3677_v6  ;;  %v3723_v6 = vld [vmem:[%s4676_s1 + $0x558] sm:$0xff]  }
  0x8d   :  { %3387 = vmatpush3.bf16.msra.mxu1 %v3678_v7  ;;  %3366 = vmatprep.subr.bf16.mxu0 %v3679_v8  ;;  %v3724_v7 = vld [vmem:[%s4676_s1 + $0x5d8] sm:$0xff]  }
  0x8e   :  { %3388 = vmatprep.subr.bf16.mxu1 %v3680_v9  ;;  %v3725_v8 = vld [vmem:[%s4676_s1 + $0x518] sm:$0xff]  }
  0x8f   :  { %v3726_v9 = vld [vmem:[%s4676_s1 + $0x598] sm:$0xff]  }
  0x90   :  { %3367 = vmatpush3.bf16.msra.mxu0 %v3681_v10  ;;  %v3727_v10 = vld [vmem:[%s4676_s1 + $0x560] sm:$0xff]  }
  0x91   :  { %3389 = vmatpush3.bf16.msra.mxu1 %v3682_v11  ;;  %3368 = vmatprep.subr.bf16.mxu0 %v3683_v12  ;;  %v3728_v11 = vld [vmem:[%s4676_s1 + $0x5e0] sm:$0xff]  }
  0x92   :  { %3390 = vmatprep.subr.bf16.mxu1 %v3684_v13  ;;  %v3729_v12 = vld [vmem:[%s4676_s1 + $0x520] sm:$0xff]  }
  0x93   :  { %v3730_v13 = vld [vmem:[%s4676_s1 + $0x5a0] sm:$0xff]  }
  0x94   :  { %3369 = vmatpush3.bf16.msra.mxu0 %v3685_v14  ;;  %v3731_v14 = vld [vmem:[%s4676_s1 + $0x568] sm:$0xff]  }
  0x95   :  { %3391 = vmatpush3.bf16.msra.mxu1 %v3686_v15  ;;  %3370 = vmatprep.subr.bf16.mxu0 %v3687_v16  ;;  %v3732_v15 = vld [vmem:[%s4676_s1 + $0x5e8] sm:$0xff]  }
  0x96   :  { %3392 = vmatprep.subr.bf16.mxu1 %v3688_v17  ;;  %v3733_v16 = vld [vmem:[%s4676_s1 + $0x528] sm:$0xff]  }
  0x97   :  { %v3734_v17 = vld [vmem:[%s4676_s1 + $0x5a8] sm:$0xff]  }
  0x98   :  { %3371 = vmatpush3.bf16.msra.mxu0 %v3689_v18  ;;  %v3735_v18 = vld [vmem:[%s4676_s1 + $0x570] sm:$0xff]  }
  0x99   :  { %3393 = vmatpush3.bf16.msra.mxu1 %v3690_v19  ;;  %3372 = vmatprep.subr.bf16.mxu0 %v3691_v20  ;;  %v3736_v19 = vld [vmem:[%s4676_s1 + $0x5f0] sm:$0xff]  }
  0x9a   :  { %3394 = vmatprep.subr.bf16.mxu1 %v3692_v21  ;;  %v3737_v20 = vld [vmem:[%s4676_s1 + $0x530] sm:$0xff]  }
  0x9b   :  { %v3738_v21 = vld [vmem:[%s4676_s1 + $0x5b0] sm:$0xff]  }
  0x9c   :  { %3373 = vmatpush3.bf16.msra.mxu0 %v3693_v22  ;;  %v3739_v22 = vld [vmem:[%s4676_s1 + $0x578] sm:$0xff]  }
  0x9d   :  { %3395 = vmatpush3.bf16.msra.mxu1 %v3694_v23  ;;  %3374 = vmatprep.subr.bf16.mxu0 %v3695_v24  ;;  %v3740_v23 = vld [vmem:[%s4676_s1 + $0x5f8] sm:$0xff]  }
  0x9e   :  { %3396 = vmatprep.subr.bf16.mxu1 %v3696_v25  ;;  %v3741_v24 = vld [vmem:[%s4676_s1 + $0x538] sm:$0xff]  }
  0x9f   :  { %v3742_v25 = vld [vmem:[%s4676_s1 + $0x5b8] sm:$0xff]  }
  0xa0   :  { %3375 = vmatpush3.bf16.msra.mxu0 %v3697_v26  ;;  %v3743_v26 = vld [vmem:[%s4675_s0 + $0x28] ss:$48 sps:$4 sm:$0xff]  }
  0xa1   :  { %3397 = vmatpush3.bf16.msra.mxu1 %v3698_v27  ;;  %3404 = vmatprep.subr.bf16.mxu0 %v3711_v42  ;;  %v3745_v27 = vld [vmem:[%s4675_s0 + $0x88] ss:$48 sps:$4 sm:$0xff]   ;;  %v320_v30 = vrot.slane %v3743_v26, %v3960_v43 }
  0xa2   :  { %3426 = vmatprep.subr.bf16.mxu1 %v3712_v48  ;;  %v334_v34 = vrot.slane %v3745_v27, %v3960_v43  ;;  %v558_v48 = vcombine.low %v536_v36, %v550_v37  ;;  %v2973_v43 = vld [vmem:[%s4677_s2] ss:$0 sm:$0xff]  ;;  %v3756_v26 = vld [vmem:[%s4678_s3 + $0x8] sm:$0xff]   ;;  %v3757_v27 = vld [vmem:[%s4678_s3 + $0x10] sm:$0xff]  }
  0xa3   :  { %2538 = vmatmul.mubr.bf16.vlgmr.msra.gmra.mrb[16].mxu0 %v626_v59 }
  0xa4   :  { %2579 = vmatmul.mubr.bf16.vlgmr.msra.gmra.mrb[16].mxu1 %v628_v62  ;;  %3405 = vmatpush3.bf16.msra.mxu0 %v3713_v52  ;;  %v343_v42 = vcombine.high %v320_v30, %v334_v34  ;;  %v342_v46 = vcombine.low %v320_v30, %v334_v34  ;;  %v560_v52 = vcombine.low %v543_v41, %v557_v45 }
  0xa5   :  { %3427 = vmatpush3.bf16.msra.mxu1 %v3714_v57  ;;  %3406 = vmatprep.subr.bf16.mxu0 %v3715_v60 }
  0xa6   :  { %3428 = vmatprep.subr.bf16.mxu1 %v3716_v63  ;;  %v631_v50 = vpack.c.bf16 %v559_v44, %v343_v42  ;;  %v630_v53 = vpack.c.bf16 %v558_v48, %v342_v46  ;;  %v632_v55 = vpack.c.bf16 %v560_v52, %v344_v49  ;;  %2660 = vmatprep.mubr.bf16.mxu1 %v633_v54 }
  0xa8   :  { %3407 = vmatpush3.bf16.msra.mxu0 %v3717_v0  ;;  %2619 = vmatprep.mubr.bf16.mxu0 %v631_v50 }
  0xa9   :  { %3429 = vmatpush3.bf16.msra.mxu1 %v3718_v1  ;;  %3408 = vmatprep.subr.bf16.mxu0 %v3719_v2 }
  0xaa   :  { %3430 = vmatprep.subr.bf16.mxu1 %v3720_v3 }
  0xac   :  { %3409 = vmatpush3.bf16.msra.mxu0 %v3721_v4 }
  0xad   :  { %3431 = vmatpush3.bf16.msra.mxu1 %v3722_v5  ;;  %3410 = vmatprep.subr.bf16.mxu0 %v3723_v6 }
  0xae   :  { %3432 = vmatprep.subr.bf16.mxu1 %v3724_v7 }
  0xb0   :  { %3411 = vmatpush3.bf16.msra.mxu0 %v3725_v8  ;;  %v3755_v8 = vld [vmem:[%s4678_s3] sm:$0xff]  }
  0xb1   :  { %3433 = vmatpush3.bf16.msra.mxu1 %v3726_v9  ;;  %3412 = vmatprep.subr.bf16.mxu0 %v3727_v10  ;;  %v3787_v9 = vmov 0.0  }
  0xb2   :  { %3434 = vmatprep.subr.bf16.mxu1 %v3728_v11 }
  0xb4   :  { %3413 = vmatpush3.bf16.msra.mxu0 %v3729_v12 }
  0xb5   :  { %3435 = vmatpush3.bf16.msra.mxu1 %v3730_v13  ;;  %3414 = vmatprep.subr.bf16.mxu0 %v3731_v14 }
  0xb6   :  { %3436 = vmatprep.subr.bf16.mxu1 %v3732_v15 }
  0xb8   :  { %3415 = vmatpush3.bf16.msra.mxu0 %v3733_v16 }
  0xb9   :  { %3437 = vmatpush3.bf16.msra.mxu1 %v3734_v17  ;;  %3416 = vmatprep.subr.bf16.mxu0 %v3735_v18 }
  0xba   :  { %3438 = vmatprep.subr.bf16.mxu1 %v3736_v19 }
  0xbc   :  { %3417 = vmatpush3.bf16.msra.mxu0 %v3737_v20 }
  0xbd   :  { %3439 = vmatpush3.bf16.msra.mxu1 %v3738_v21  ;;  %3418 = vmatprep.subr.bf16.mxu0 %v3739_v22 }
  0xbe   :  { %3440 = vmatprep.subr.bf16.mxu1 %v3740_v23 }
  0xc0   :  { %3419 = vmatpush3.bf16.msra.mxu0 %v3741_v24 }
  0xc1   :  { %3441 = vmatpush3.bf16.msra.mxu1 %v3742_v25  ;;  %3458 = vmatprep.subr.bf16.mxu0 %v3787_v9 }
  0xc2   :  { %3470 = vmatprep.subr.bf16.mxu1 %v3787_v9 }
  0xc3   :  { %2620 = vmatmul.mubr.bf16.vlgmr.msra.gmra.mrb[20].mxu0 %v630_v53 }
  0xc4   :  { %2661 = vmatmul.mubr.bf16.vlgmr.msra.gmra.mrb[20].mxu1 %v632_v55  ;;  %3459 = vmatpush3.bf16.msra.mxu0 %v3755_v8 }
  0xc5   :  { %3460 = vmatprep.subr.bf16.mxu0 %v3787_v9  ;;  %3466 = vmatprep.mubr.msk.bf16.mxu0 %vm3788_vm0, %v3787_v9 }
  0xc6   :  { %3474 = vmatprep.mubr.msk.bf16.mxu1 %vm3788_vm0, %v3787_v9 }
  0xc8   :  { %3461 = vmatpush3.bf16.msra.mxu0 %v3756_v26 }
  0xc9   :  { %3462 = vmatprep.subr.bf16.mxu0 %v3787_v9 }
  0xcc   :  { %3463 = vmatpush3.bf16.msra.mxu0 %v3757_v27 }
  0xcd   :  { %3464 = vmatprep.subr.bf16.mxu0 %v3787_v9 }
  0xd0   :  { %3465 = vmatpush3.bf16.msra.mxu0 %v3758_v28 }
  0xf6   :  { %v3200_v56 = vpop.f32.mrb[0].mxu0 }
  0xf7   :  { %v3222_v57 = vpop.f32.mrb[0].mxu1  ;;  %v3201_v58 = vpop.f32.mrb[1].mxu0 }
  0xf8   :  { %v3202_v59 = vadd.f32 %v3201_v58, %v3200_v56  ;;  %v3223_v60 = vpop.f32.mrb[1].mxu1  ;;  %v3203_v61 = vpop.f32.mrb[2].mxu0 }
  0xf9   :  { %v3224_v62 = vadd.f32 %v3223_v60, %v3222_v57  ;;  %v3225_v63 = vpop.f32.mrb[2].mxu1  ;;  %v3204_v0 = vpop.f32.mrb[3].mxu0 }
  0xfa   :  { %v2212_v1 = vadd.f32 %v3202_v59, %v2973_v43  ;;  %v3205_v2 = vadd.f32 %v3204_v0, %v3203_v61  ;;  %v3226_v3 = vpop.f32.mrb[3].mxu1 }
  0xfb   :  { %v3227_v4 = vadd.f32 %v3226_v3, %v3225_v63 }
  0xfc   :  { %v2253_v5 = vadd.f32 %v3224_v62, %v2212_v1  ;;  %v2215_v6 = vadd.f32 %v3205_v2, %v2973_v43 }
  0xfe   :  { %v2256_v7 = vadd.f32 %v3227_v4, %v2215_v6 }
 0x116   :  { %v3244_v10 = vpop.f32.mrb[4].mxu0 }
 0x117   :  { %v3266_v11 = vpop.f32.mrb[4].mxu1  ;;  %v3245_v12 = vpop.f32.mrb[5].mxu0 }
 0x118   :  { %v3246_v13 = vadd.f32 %v3245_v12, %v3244_v10  ;;  %v3267_v14 = vpop.f32.mrb[5].mxu1  ;;  %v3247_v15 = vpop.f32.mrb[6].mxu0 }
 0x119   :  { %v3268_v16 = vadd.f32 %v3267_v14, %v3266_v11  ;;  %v3269_v17 = vpop.f32.mrb[6].mxu1  ;;  %v3248_v18 = vpop.f32.mrb[7].mxu0 }
 0x11a   :  { %v2294_v19 = vadd.f32 %v3246_v13, %v2253_v5  ;;  %v3249_v20 = vadd.f32 %v3248_v18, %v3247_v15  ;;  %v3270_v21 = vpop.f32.mrb[7].mxu1 }
 0x11b   :  { %v3271_v22 = vadd.f32 %v3270_v21, %v3269_v17 }
 0x11c   :  { %v2335_v23 = vadd.f32 %v3268_v16, %v2294_v19  ;;  %v2297_v24 = vadd.f32 %v3249_v20, %v2256_v7 }
 0x11e   :  { %v2338_v25 = vadd.f32 %v3271_v22, %v2297_v24 }
 0x136   :  { %v3288_v29 = vpop.f32.mrb[8].mxu0 }
 0x137   :  { %v3289_v30 = vpop.f32.mrb[9].mxu0  ;;  %v3310_v31 = vpop.f32.mrb[8].mxu1 }
 0x138   :  { %v3290_v32 = vadd.f32 %v3289_v30, %v3288_v29  ;;  %v3291_v33 = vpop.f32.mrb[10].mxu0  ;;  %v3311_v34 = vpop.f32.mrb[9].mxu1 }
 0x139   :  { %v3292_v36 = vpop.f32.mrb[11].mxu0  ;;  %v3312_v38 = vadd.f32 %v3311_v34, %v3310_v31  ;;  %v3313_v39 = vpop.f32.mrb[10].mxu1  ;;  %v3759_v34 = vld [vmem:[%s4680_s5] sm:$0xff]  }
 0x13a   :  { %v2376_v37 = vadd.f32 %v3290_v32, %v2335_v23  ;;  %v3293_v40 = vadd.f32 %v3292_v36, %v3291_v33  ;;  %v3314_v41 = vpop.f32.mrb[11].mxu1  ;;  %3471 = vmatpush3.bf16.msra.mxu1 %v3759_v34  ;;  %v3760_v36 = vld [vmem:[%s4680_s5 + $0x8] sm:$0xff]  }
 0x13b   :  { %v3315_v45 = vadd.f32 %v3314_v41, %v3313_v39  ;;  %3472 = vmatprep.subr.bf16.mxu1 %v3787_v9 }
 0x13c   :  { %v2417_v42 = vadd.f32 %v3312_v38, %v2376_v37  ;;  %v2379_v44 = vadd.f32 %v3293_v40, %v2338_v25  ;;  %v3166_v37 = vld [vmem:[%s4679_s4] ss:$0 sm:$0xff] }
 0x13e   :  { %v2420_v46 = vadd.f32 %v3315_v45, %v2379_v44  ;;  %3473 = vmatpush3.bf16.msra.mxu1 %v3760_v36 }
 0x13f   :  { %3478 = vmatprep.subr.bf16.mxu1 %v3787_v9 }
 0x156   :  { %v3332_v47 = vpop.f32.mrb[12].mxu0 }
 0x157   :  { %v3354_v48 = vpop.f32.mrb[12].mxu1  ;;  %v3333_v49 = vpop.f32.mrb[13].mxu0 }
 0x158   :  { %v3334_v50 = vadd.f32 %v3333_v49, %v3332_v47  ;;  %v3355_v51 = vpop.f32.mrb[13].mxu1  ;;  %v3335_v52 = vpop.f32.mrb[14].mxu0  ;;  %v3172_v49 = vld [vmem:[%s4681_s6] ss:$0 sm:$0xff] }
 0x159   :  { %v3356_v53 = vadd.f32 %v3355_v51, %v3354_v48  ;;  %v3357_v54 = vpop.f32.mrb[14].mxu1  ;;  %v3336_v55 = vpop.f32.mrb[15].mxu0  ;;  %v3761_v48 = vld [vmem:[%s4682_s7] sm:$0xff]  }
 0x15a   :  { %v2458_v56 = vadd.f32 %v3334_v50, %v2417_v42  ;;  %v3337_v57 = vadd.f32 %v3336_v55, %v3335_v52  ;;  %v3358_v43 = vpop.f32.mrb[15].mxu1 }
 0x15b   :  { %v3359_v58 = vadd.f32 %v3358_v43, %v3357_v54 }
 0x15c   :  { %v2499_v59 = vadd.f32 %v3356_v53, %v2458_v56  ;;  %v2461_v60 = vadd.f32 %v3337_v57, %v2420_v46 }
 0x15e   :  { %v2502_v61 = vadd.f32 %v3359_v58, %v2461_v60  ;;  %v3176_v60 = vld [vmem:[%s4683_s8] ss:$0 sm:$0xff] }
 0x176   :  { %v3376_v62 = vpop.f32.mrb[16].mxu0 }
 0x177   :  { %v3398_v63 = vpop.f32.mrb[16].mxu1  ;;  %v3377_v0 = vpop.f32.mrb[17].mxu0 }
 0x178   :  { %v3378_v1 = vadd.f32 %v3377_v0, %v3376_v62  ;;  %v3399_v2 = vpop.f32.mrb[17].mxu1  ;;  %v3379_v3 = vpop.f32.mrb[18].mxu0 }
 0x179   :  { %v3400_v4 = vadd.f32 %v3399_v2, %v3398_v63  ;;  %v3401_v5 = vpop.f32.mrb[18].mxu1  ;;  %v3380_v6 = vpop.f32.mrb[19].mxu0 }
 0x17a   :  { %v2540_v7 = vadd.f32 %v3378_v1, %v2499_v59  ;;  %v3381_v8 = vadd.f32 %v3380_v6, %v3379_v3  ;;  %v3402_v10 = vpop.f32.mrb[19].mxu1 }
 0x17b   :  { %v3403_v11 = vadd.f32 %v3402_v10, %v3401_v5 }
 0x17c   :  { %v2581_v12 = vadd.f32 %v3400_v4, %v2540_v7  ;;  %v2543_v13 = vadd.f32 %v3381_v8, %v2502_v61 }
 0x17e   :  { %v2584_v14 = vadd.f32 %v3403_v11, %v2543_v13 }
 0x196   :  { %v3420_v15 = vpop.f32.mrb[20].mxu0 }
 0x197   :  { %v3421_v16 = vpop.f32.mrb[21].mxu0  ;;  %v3442_v17 = vpop.f32.mrb[20].mxu1 }
 0x198   :  { %v3422_v18 = vadd.f32 %v3421_v16, %v3420_v15  ;;  %v3423_v19 = vpop.f32.mrb[22].mxu0  ;;  %v3443_v20 = vpop.f32.mrb[21].mxu1 }
 0x199   :  { %v3424_v21 = vpop.f32.mrb[23].mxu0  ;;  %v3444_v23 = vadd.f32 %v3443_v20, %v3442_v17  ;;  %v3445_v24 = vpop.f32.mrb[22].mxu1 }
 0x19a   :  { %v2622_v22 = vadd.f32 %v3422_v18, %v2581_v12  ;;  %v3425_v25 = vadd.f32 %v3424_v21, %v3423_v19  ;;  %v3446_v26 = vpop.f32.mrb[23].mxu1 }
 0x19b   :  { %v3447_v29 = vadd.f32 %v3446_v26, %v3445_v24 }
 0x19c   :  { %v2663_v27 = vadd.f32 %v3444_v23, %v2622_v22  ;;  %v2625_v28 = vadd.f32 %v3425_v25, %v2584_v14 }
 0x19e   :  { %v2666_v30 = vadd.f32 %v3447_v29, %v2625_v28  ;;  %v2669_v31 = vmax.f32 %v2663_v27, 0.0 }
 0x1a0   :  { %v2670_v32 = vmax.f32 %v2666_v30, 0.0 }
 0x1a2   :  { %v2671_v33 = vpack.c.bf16 %v2670_v32, %v2669_v31 }
 0x1a4   :  { %3467 = vmatmul.mubr.msk.bf16.vlgmr.msra.gmra.mrb[24].mxu0 %vm2711_vm1, %v2671_v33 }
 0x277   :  { %v2749_v38 = vpop.f32.mrb[24].mxu0 }
 0x278   :  { %v2750_v39 = vadd.f32 %v3166_v37, %v2749_v38  ;;  %v3468_v40 = vpop.f32.mrb[25].mxu0 }
 0x279   :  { %v2752_v41 = vpop.f32.mrb[26].mxu0 }
 0x27a   :  { %v2753_v42 = vadd.f32 %v3166_v37, %v2752_v41  ;;  %v3469_v44 = vpop.f32.mrb[27].mxu0  ;;  %v2756_v45 = vmax.f32 %v2750_v39, 0.0 }
 0x27c   :  { %v2757_v46 = vmax.f32 %v2753_v42, 0.0 }
 0x27e   :  { %v2758_v47 = vpack.c.bf16 %v2757_v46, %v2756_v45 }
 0x280   :  { %3475 = vmatmul.mubr.msk.bf16.vlgmr.msra.gmra.mrb[24].mxu1 %vm2782_vm2, %v2758_v47 }
 0x281   :  { %3480 = vmatprep.mubr.msk.bf16.mxu1 %vm3788_vm0, %v3787_v9  ;;  %3479 = vmatpush3.bf16.msra.mxu1 %v3761_v48  ;;  %v3789_v9 = vmov 1966171168  }
 0x282   :  { %v2894_v58 = vunpack.c.l.s4 %v3789_v9 }
 0x284   :  { %v2895_v59 = vunpack.c.0.s8 %v2894_v58 }
 0x286   :  { %v2898_v2 = vsub.s32 %v2895_v59, %v3939_v35 }
 0x353   :  { %v2820_v50 = vpop.f32.mrb[24].mxu1 }
 0x354   :  { %v2821_v51 = vadd.f32 %v3172_v49, %v2820_v50  ;;  %v3476_v52 = vpop.f32.mrb[25].mxu1 }
 0x355   :  { %v2823_v53 = vpop.f32.mrb[26].mxu1 }
 0x356   :  { %v2824_v54 = vadd.f32 %v3172_v49, %v2823_v53  ;;  %v3477_v55 = vpop.f32.mrb[27].mxu1  ;;  %v2827_v56 = vmax.f32 %v2821_v51, 0.0 }
 0x358   :  { %v2828_v57 = vmax.f32 %v2824_v54, 0.0 }
 0x35a   :  { %v2829_v43 = vpack.c.bf16 %v2828_v57, %v2827_v56 }
 0x35c   :  { %3481 = vmatmul.mubr.msk.bf16.vlgmr.msra.gmra.mrb[28].mxu1 %vm2845_vm3, %v2829_v43 }
 0x42f   :  { %v2883_v61 = vpop.f32.mrb[28].mxu1 }
 0x430   :  { %v3482_v62 = vpop.f32.mrb[29].mxu1  ;;  %v2884_v0 = vadd.f32 %v3176_v60, %v2883_v61 }
 0x431   :  { %v2886_v63 = vpop.f32.mrb[30].mxu1 }
 0x432   :  { %v2887_v1 = vadd.f32 %v3176_v60, %v2886_v63  ;;  %v3483_v3 = vpop.f32.mrb[31].mxu1 }
 0x434   :  { %v2890_v4 = vpack.c.bf16 %v2887_v1, %v2884_v0  ;;  %v3179_v5 = vpack.c.bf16 %v2887_v1, %v2887_v1 }
 0x436   :  { %v2899_v6 = vrot.slane %v2890_v4, %v2898_v2  ;;  %v2906_v7 = vrot.slane %v3179_v5, %v2898_v2 }
 0x438   :  { %v2907_v8 = vcombine.high %v2899_v6, %v2899_v6  ;;  %v2908_v10 = vcombine.high %v2906_v7, %v2906_v7  ;;  %v2915_v11 = vrot.slane %v2899_v6, %v2898_v2  ;;  %v2922_v12 = vrot.slane %v2906_v7, %v2898_v2  ;;  %3180 = vst.sshfl [vmem:[#allocation2] sm:$0x1 pattern:$0x73625140] %v2899_v6 }
 0x439   :  { %3182 = vst.sshfl [vmem:[#allocation2 + $0x4] sm:$0x1 pattern:$0x73625140] %v2906_v7 }
 0x43a   :  { %v2929_v13 = vrot.slane %v2907_v8, %v2898_v2  ;;  %v2936_v14 = vrot.slane %v2908_v10, %v2898_v2  ;;  %v2937_v15 = vcombine.high %v2915_v11, %v2915_v11  ;;  %v2938_v16 = vcombine.high %v2922_v12, %v2922_v12  ;;  %3181 = vst.sshfl [vmem:[#allocation2 + $0x1] sm:$0x1 pattern:$0x73625140] %v2907_v8 }
 0x43b   :  { %3183 = vst.sshfl [vmem:[#allocation2 + $0x5] sm:$0x1 pattern:$0x73625140] %v2908_v10 }
 0x43c   :  { %v2939_v17 = vcombine.high %v2929_v13, %v2929_v13  ;;  %v2940_v18 = vcombine.high %v2936_v14, %v2936_v14  ;;  %2951 = vst [vmem:[#allocation2 + $0x2] sm:$0x1] %v2937_v15  ;;  %2955 = vst [vmem:[#allocation2 + $0x6] sm:$0x1] %v2938_v16 }
 0x43e   :  { %2952 = vst [vmem:[#allocation2 + $0x3] sm:$0x1] %v2939_v17  ;;  %2956 = vst [vmem:[#allocation2 + $0x7] sm:$0x1] %v2940_v18 }
 0x43f   :  { %2961 = vsyncadd [#allocation3], 112  ;;  %s3790_s6 = smov [#allocation2]  }
 0x440   :  { %s2962_s8 = sshll.u32 %s3790_s6, 4  ;;  %s2963_s8 = int_to_ptr.vmem [resolvable:$true] %s2962_s8 }
 0x441   :  { %s3762_s20 = scalar_lea.vmem %s2963_s8, 16  ;;  %s3766_s21 = scalar_lea.vmem %s2963_s8, 128 }
 0x442   :  { %p3763_p0 = scmp.ne.s32.totalorder %s2963_s8, %s3762_s20  ;;  %p3767_p1 = scmp.lt.s32.totalorder %s2963_s8, %s2963_s8 }
 0x443   :  { %p3768_p2 = scmp.lt.s32.totalorder %s3766_s21, %s3762_s20 }
 0x445   :  { %p3769_p3 = por %p3768_p2, %p3767_p1 }
 0x447   :  { %p3770_p4 = pnand %p3769_p3, %p3763_p0 }
 0x449   :  { %3773 = shalt.err (!%p3770_p4)
}
 0x44a   :  { %s3774_s24 = scalar_lea.hbm %s4684_s9, 16 }
 0x44b   :  { %p3775_p5 = scmp.ne.s32.totalorder %s4684_s9, %s3774_s24  ;;  %p3778_p6 = scmp.lt.u32.totalorder %s3774_s24, %s4684_s9 }
 0x44d   :  { %p3780_p7 = pnand %p3778_p6, %p3775_p5 }
 0x44f   :  { %3783 = shalt.err (!%p3780_p7)
}
 0x450   :  { %s3791_s28 = smov 16   ;;  %s3792_s2 = smov 1  }
 0x451   :  { %2968 = dma.vmem_to_hbm [thread:$0]  %s2963_s8, 16, %s4684_s9, [#allocation3], %s3791_s28, %s3791_s28, %s3792_s2  }
 0x452   :  { %3784 = dma.done.wait [#allocation3], 128  }
 0x453   :  { %3785 = vsyncadd [#allocation3], 4294967168 }
 0x454   :  { %2972 = vsyncpa [#allocation3], 1 }

</bundles_post_ra>
